<compile_context>
chip_gen: v5e
topology: v5e:2x2
jax: 0.10.0
libtpu: 0.0.40
codegen_flags: <defaults>
</compile_context>

<pallas_src>
import functools
import math

import jax
import jax.numpy as jnp
from jax import lax
from jax.experimental import pallas as pl
from jax.experimental.pallas import tpu as pltpu


# -----------------------------------------------------------------------------
# Kernel
# -----------------------------------------------------------------------------
def _complex_lstm_kernel(
    # inputs
    x_ref,    # (Tt, BB, 2I)    f32  : [x_re | x_im]
    w_ref,    # (2I+2H, 8H)     bf16 : fused complex weights
    b_ref,    # (1, 8H)         f32  : bi + bh, [re | im]
    h0_ref,   # (BB, 2H)        f32  : [h_re | h_im]
    c0_ref,   # (BB, 2H)        f32
    # outputs
    y_ref,    # (Tt, BB, 2H)    f32  : [h_re | h_im]
    hc_ref,   # (BB, 4H)        f32  : [h_re | h_im | c_re | c_im]
    # scratch (persists across the sequential time grid)
    h_s, c_s,  # (BB, 2H) f32
    *, H, T, Tt,
):
    tb = pl.program_id(1)          # time-block index (innermost, "arbitrary")
    BB = x_ref.shape[1]

    @pl.when(tb == 0)
    def _():
        h_s[...] = h0_ref[...]
        c_s[...] = c0_ref[...]

    # loop-invariant values, hoisted out of the timestep loop
    w = w_ref[...]                                                   # (2I+2H, 8H) bf16
    bias = jnp.broadcast_to(b_ref[...], (BB, 8 * H))                 # (BB, 8H) f32
    col = lax.broadcasted_iota(jnp.int32, (BB, 4 * H), 1)
    sig_mask = col < 3 * H        # first 3H gate cols -> modSigmoid, last H -> modTanh

    def step(s, carry):
        h_cat, c_cat = carry                                         # (BB, 2H) f32 each

        # one fused complex matmul on the MXU (bf16 in, f32 accumulate)
        z = jnp.concatenate([x_ref[s], h_cat], axis=1).astype(jnp.bfloat16)
        pre = jnp.dot(z, w, preferred_element_type=jnp.float32) + bias
        pre_re = pre[:, : 4 * H]
        pre_im = pre[:, 4 * H:]

        # phase-preserving activations: act(|z|) * z / |z|, rsqrt formulation
        sq = pre_re * pre_re + pre_im * pre_im
        inv = lax.rsqrt(jnp.maximum(sq, 1e-16))
        mag = sq * inv                                               # == |z| (guarded)
        scale = jnp.where(sig_mask, jax.nn.sigmoid(mag), jnp.tanh(mag)) * inv
        a_re = scale * pre_re
        a_im = scale * pre_im

        # gate order from the reference module: (i, f, o) sigmoid, g = tanh block
        i_re, f_re, o_re, g_re = (a_re[:, :H], a_re[:, H:2 * H],
                                  a_re[:, 2 * H:3 * H], a_re[:, 3 * H:])
        i_im, f_im, o_im, g_im = (a_im[:, :H], a_im[:, H:2 * H],
                                  a_im[:, 2 * H:3 * H], a_im[:, 3 * H:])
        c_re, c_im = c_cat[:, :H], c_cat[:, H:]

        # c_t = c * f + i * g   (element-wise per plane, as in torch.mul)
        ct_re = c_re * f_re + i_re * g_re
        ct_im = c_im * f_im + i_im * g_im

        # h_t = o (*) modTanh(c_t)   (true complex multiplication)
        sqc = ct_re * ct_re + ct_im * ct_im
        invc = lax.rsqrt(jnp.maximum(sqc, 1e-16))
        sc = jnp.tanh(sqc * invc) * invc
        tc_re = sc * ct_re
        tc_im = sc * ct_im
        ht_re = o_re * tc_re - o_im * tc_im
        ht_im = o_re * tc_im + o_im * tc_re

        h_new = jnp.concatenate([ht_re, ht_im], axis=1)
        c_new = jnp.concatenate([ct_re, ct_im], axis=1)

        if T % Tt != 0:
            # mask state updates on time-padding steps so the final (h, c) is exact
            m = ((tb * Tt + s) < T).astype(jnp.float32)
            h_new = m * h_new + (1.0 - m) * h_cat
            c_new = m * c_new + (1.0 - m) * c_cat

        y_ref[s] = h_new
        return h_new, c_new

    h_cat, c_cat = lax.fori_loop(0, Tt, step, (h_s[...], c_s[...]), unroll=True)
    h_s[...] = h_cat
    c_s[...] = c_cat

    @pl.when(tb == pl.num_programs(1) - 1)
    def _():
        hc_ref[...] = jnp.concatenate([h_cat, c_cat], axis=1)


# -----------------------------------------------------------------------------
# Layer wrapper (pallas_call)
# -----------------------------------------------------------------------------
def complex_lstm_layer(x_cat, w_fused, b_fused, h0_cat, c0_cat, hidden_size,
                       *, t_tile=8, batch_block=128):
    """One ComplexLSTM layer over a full sequence.

    x_cat : (T, B, 2I) f32 time-major, [x_re | x_im]
    returns (y_cat: (T, B, 2H), hc: (B, 4H)) trimmed to the original T, B.
    """
    T, B, in2 = x_cat.shape
    H = hidden_size
    KD = w_fused.shape[0]          # 2I + 2H
    assert in2 + 2 * H == KD

    # Sublane fill: pad batch to a multiple of 8; batch grid axis for megacore.
    B_pad = max(8, ((B + 7) // 8) * 8)
    BB = min(batch_block, B_pad)
    B_pad = ((B_pad + BB - 1) // BB) * BB
    Tt = min(t_tile, T)
    T_pad = ((T + Tt - 1) // Tt) * Tt

    if (T_pad, B_pad) != (T, B):
        x_cat = jnp.pad(x_cat, ((0, T_pad - T), (0, B_pad - B), (0, 0)))
    if B_pad != B:
        h0_cat = jnp.pad(h0_cat, ((0, B_pad - B), (0, 0)))
        c0_cat = jnp.pad(c0_cat, ((0, B_pad - B), (0, 0)))

    nb, nt = B_pad // BB, T_pad // Tt
    kernel = functools.partial(_complex_lstm_kernel, H=H, T=T, Tt=Tt)

    # TODO(synk): for very large H on v7x (64 MiB VMEM), keep weights single-buffered
    #             (pipeline_mode) or stage them from pl.ANY once; not needed at these sizes.
    grid_spec = pltpu.PrefetchScalarGridSpec(
        num_scalar_prefetch=0,
        grid=(nb, nt),
        in_specs=[
            pl.BlockSpec((Tt, BB, in2), lambda b, t: (t, b, 0)),     # x_cat
            pl.BlockSpec((KD, 8 * H), lambda b, t: (0, 0)),          # fused weights (bf16)
            pl.BlockSpec((1, 8 * H), lambda b, t: (0, 0)),           # fused bias
            pl.BlockSpec((BB, 2 * H), lambda b, t: (b, 0)),          # h0
            pl.BlockSpec((BB, 2 * H), lambda b, t: (b, 0)),          # c0
        ],
        out_specs=[
            pl.BlockSpec((Tt, BB, 2 * H), lambda b, t: (t, b, 0)),   # y (lane-dense)
            pl.BlockSpec((BB, 4 * H), lambda b, t: (b, 0)),          # final [h|c]
        ],
        scratch_shapes=[pltpu.VMEM((BB, 2 * H), jnp.float32)] * 2,
    )

    out_shape = (
        jax.ShapeDtypeStruct((T_pad, B_pad, 2 * H), jnp.float32),
        jax.ShapeDtypeStruct((B_pad, 4 * H), jnp.float32),
    )

    y_cat, hc = pl.pallas_call(
        kernel,
        out_shape=out_shape,
        grid_spec=grid_spec,
        compiler_params=pltpu.CompilerParams(
            dimension_semantics=("parallel", "arbitrary"),  # batch parallel, time sequential
        ),
    )(x_cat, w_fused, b_fused, h0_cat, c0_cat)

    return y_cat[:T, :B], hc[:B]


# -----------------------------------------------------------------------------
# Parameter handling
# -----------------------------------------------------------------------------
def init_complex_lstm_params(key, input_size, hidden_size):
    """Matches _ComplexLSTMcell.reset_parameters: U(-1/sqrt(H), 1/sqrt(H)) on every weight."""
    std = 1.0 / math.sqrt(hidden_size)
    shapes = [
        (input_size, 4 * hidden_size),   # i2h W_re (stored transposed vs nn.Linear)
        (input_size, 4 * hidden_size),   # i2h W_im
        (1, 4 * hidden_size),            # i2h b_re
        (1, 4 * hidden_size),            # i2h b_im
        (hidden_size, 4 * hidden_size),  # h2h W_re
        (hidden_size, 4 * hidden_size),  # h2h W_im
        (1, 4 * hidden_size),            # h2h b_re
        (1, 4 * hidden_size),            # h2h b_im
    ]
    keys = jax.random.split(key, len(shapes))
    return tuple(
        jax.random.uniform(k, s, jnp.float32, minval=-std, maxval=std)
        for k, s in zip(keys, shapes)
    )


def fuse_complex_lstm_params(params, matmul_dtype=jnp.bfloat16):
    """Pre-fuse the complex i2h/h2h weights into one (2I+2H, 8H) block and sum the biases."""
    wi_re, wi_im, bi_re, bi_im, wh_re, wh_im, bh_re, bh_im = params
    w = jnp.concatenate([
        jnp.concatenate([wi_re, wi_im], axis=1),
        jnp.concatenate([-wi_im, wi_re], axis=1),
        jnp.concatenate([wh_re, wh_im], axis=1),
        jnp.concatenate([-wh_im, wh_re], axis=1),
    ], axis=0).astype(matmul_dtype)
    b = jnp.concatenate([bi_re + bh_re, bi_im + bh_im], axis=1).astype(jnp.float32)
    return w, b


# -----------------------------------------------------------------------------
# Module forward (num_layers=1, unidirectional, batch_first=True, eval mode)
# -----------------------------------------------------------------------------
def complex_lstm_forward(x, params, hidden_size, hiddens=None,
                         matmul_dtype=jnp.bfloat16):
    """x: (B, T, input_size, 2) f32. Returns (y: (B, T, H, 2), (h, c): (B, H, 2))."""
    B, T, I, two = x.shape
    assert two == 2
    H = hidden_size

    # batch_first permute + split/pack real/imag planes (plain JAX glue)
    xt = jnp.transpose(x, (1, 0, 2, 3)).astype(jnp.float32)          # (T, B, I, 2)
    x_cat = jnp.concatenate([xt[..., 0], xt[..., 1]], axis=-1)       # (T, B, 2I)

    if hiddens is None:
        h0 = jnp.zeros((B, H, 2), jnp.float32)
        c0 = jnp.zeros((B, H, 2), jnp.float32)
    else:
        h0, c0 = hiddens
    h0_cat = jnp.concatenate([h0[..., 0], h0[..., 1]], axis=-1)
    c0_cat = jnp.concatenate([c0[..., 0], c0[..., 1]], axis=-1)

    w_fused, b_fused = fuse_complex_lstm_params(params, matmul_dtype)

    y_cat, hc = complex_lstm_layer(x_cat, w_fused, b_fused, h0_cat, c0_cat, H)

    y = jnp.stack([y_cat[..., :H], y_cat[..., H:]], axis=-1)         # (T, B, H, 2)
    y = jnp.transpose(y, (1, 0, 2, 3))                               # (B, T, H, 2)
    h = jnp.stack([hc[:, :H], hc[:, H:2 * H]], axis=-1)              # (B, H, 2)
    c = jnp.stack([hc[:, 2 * H:3 * H], hc[:, 3 * H:]], axis=-1)      # (B, H, 2)
    return y, (h, c)
    # TODO(synk): num_layers>1 / bidirectional stacks re-invoke this same kernel per
    #             layer/direction (with concatenated inputs); dropout is training-only.


# -----------------------------------------------------------------------------
# Pure-JAX f32 reference (for validation)
# -----------------------------------------------------------------------------
def _mod_act_ref(act, zr, zi):
    sq = zr * zr + zi * zi
    inv = lax.rsqrt(jnp.maximum(sq, 1e-16))
    s = act(sq * inv) * inv
    return s * zr, s * zi


def complex_lstm_reference(x, params, H):
    wi_re, wi_im, bi_re, bi_im, wh_re, wh_im, bh_re, bh_im = params
    B, T, I, _ = x.shape
    xr, xi = x[..., 0], x[..., 1]
    h_re = jnp.zeros((B, H), jnp.float32)
    h_im = jnp.zeros_like(h_re)
    c_re = jnp.zeros_like(h_re)
    c_im = jnp.zeros_like(h_re)
    ys = []
    for t in range(T):
        pre_re = (xr[:, t] @ wi_re - xi[:, t] @ wi_im + h_re @ wh_re - h_im @ wh_im
                  + bi_re + bh_re)
        pre_im = (xr[:, t] @ wi_im + xi[:, t] @ wi_re + h_re @ wh_im + h_im @ wh_re
                  + bi_im + bh_im)
        gr, gi = _mod_act_ref(jax.nn.sigmoid, pre_re[:, :3 * H], pre_im[:, :3 * H])
        tgr, tgi = _mod_act_ref(jnp.tanh, pre_re[:, 3 * H:], pre_im[:, 3 * H:])
        i_re, f_re, o_re = gr[:, :H], gr[:, H:2 * H], gr[:, 2 * H:]
        i_im, f_im, o_im = gi[:, :H], gi[:, H:2 * H], gi[:, 2 * H:]
        c_re = c_re * f_re + i_re * tgr
        c_im = c_im * f_im + i_im * tgi
        tr, ti = _mod_act_ref(jnp.tanh, c_re, c_im)
        h_re = o_re * tr - o_im * ti
        h_im = o_re * ti + o_im * tr
        ys.append(jnp.stack([h_re, h_im], axis=-1))
    y = jnp.stack(ys, axis=1)                                        # (B, T, H, 2)
    return y, (jnp.stack([h_re, h_im], -1), jnp.stack([c_re, c_im], -1))


# -----------------------------------------------------------------------------
if __name__ == "__main__":
    B, T, I, H = 2, 8, 16, 32
    key = jax.random.PRNGKey(0)
    kx, kp = jax.random.split(key)

    x = jax.random.normal(kx, (B, T, I, 2), jnp.float32)
    params = init_complex_lstm_params(kp, I, H)

    fwd = jax.jit(functools.partial(complex_lstm_forward, hidden_size=H))
    y, (h, c) = fwd(x, params)
    jax.block_until_ready((y, h, c))

    assert y.shape == (B, T, H, 2)
    assert h.shape == (B, H, 2)
    assert c.shape == (B, H, 2)
    assert bool(jnp.all(jnp.isfinite(y)))

    # loose numeric check vs pure-JAX f32 reference (kernel matmuls run in bf16)
    y_ref, (h_ref, c_ref) = complex_lstm_reference(x, params, H)
    err = float(jnp.max(jnp.abs(y - y_ref)))
    assert err < 1e-1, f"mismatch vs reference: {err}"

    print("KERNEL_OK")
</pallas_src>

<mosaic_0001>
module attributes {stable_mosaic.version = 11 : i64} {
  func.func @_complex_lstm_kernel(%arg0: i32, %arg1: i32, %arg2: memref<8x8x32xf32, #tpu.memory_space<vmem>>, %arg3: memref<96x256xbf16, #tpu.memory_space<vmem>>, %arg4: memref<1x256xf32, #tpu.memory_space<vmem>>, %arg5: memref<8x64xf32, #tpu.memory_space<vmem>>, %arg6: memref<8x64xf32, #tpu.memory_space<vmem>>, %arg7: memref<8x8x64xf32, #tpu.memory_space<vmem>>, %arg8: memref<8x128xf32, #tpu.memory_space<vmem>>, %arg9: memref<8x64xf32, #tpu.memory_space<vmem>>, %arg10: memref<8x64xf32, #tpu.memory_space<vmem>>) attributes {dimension_semantics = [#tpu.dimension_semantics<parallel>, #tpu.dimension_semantics<arbitrary>], iteration_bounds = array<i64: 1, 1>, scalar_prefetch = 0 : i64, scratch_operands = 2 : i64, tpu.core_type = #tpu.core_type<tc>, window_params = [{transform_indices = @transform_0, window_bounds = array<i64: 8, 8, 32>}, {pipeline_mode = #tpu.pipeline_mode<synchronous>, transform_indices = @transform_1, window_bounds = array<i64: 96, 256>}, {pipeline_mode = #tpu.pipeline_mode<synchronous>, transform_indices = @transform_2, window_bounds = array<i64: 1, 256>}, {transform_indices = @transform_3, window_bounds = array<i64: 8, 64>}, {transform_indices = @transform_4, window_bounds = array<i64: 8, 64>}, {transform_indices = @transform_5, window_bounds = array<i64: 8, 8, 64>}, {transform_indices = @transform_6, window_bounds = array<i64: 8, 128>}]} {
    %c0_i32 = arith.constant 0 : i32
    %0 = arith.cmpi eq, %arg1, %c0_i32 : i32
    %1 = arith.extui %0 : i1 to i32
    %c0_i32_0 = arith.constant 0 : i32
    %2 = arith.cmpi ne, %1, %c0_i32_0 : i32
    scf.if %2 {
      %c0_78 = arith.constant 0 : index
      %c0_79 = arith.constant 0 : index
      %537 = vector.load %arg5[%c0_78, %c0_79] : memref<8x64xf32, #tpu.memory_space<vmem>>, vector<8x64xf32>
      %c0_80 = arith.constant 0 : index
      %c0_81 = arith.constant 0 : index
      %538 = vector.load %arg9[%c0_80, %c0_81] : memref<8x64xf32, #tpu.memory_space<vmem>>, vector<8x64xf32>
      tpu.vector_store %arg9[%c0_80, %c0_81], %537 {strides = array<i32>} : memref<8x64xf32, #tpu.memory_space<vmem>>, vector<8x64xf32>,
      %c0_82 = arith.constant 0 : index
      %c0_83 = arith.constant 0 : index
      %539 = vector.load %arg6[%c0_82, %c0_83] : memref<8x64xf32, #tpu.memory_space<vmem>>, vector<8x64xf32>
      %c0_84 = arith.constant 0 : index
      %c0_85 = arith.constant 0 : index
      %540 = vector.load %arg10[%c0_84, %c0_85] : memref<8x64xf32, #tpu.memory_space<vmem>>, vector<8x64xf32>
      tpu.vector_store %arg10[%c0_84, %c0_85], %539 {strides = array<i32>} : memref<8x64xf32, #tpu.memory_space<vmem>>, vector<8x64xf32>,
    } else {
    }
    %c0 = arith.constant 0 : index
    %c0_1 = arith.constant 0 : index
    %3 = vector.load %arg3[%c0, %c0_1] : memref<96x256xbf16, #tpu.memory_space<vmem>>, vector<96x256xbf16>
    %c0_2 = arith.constant 0 : index
    %c0_3 = arith.constant 0 : index
    %4 = vector.load %arg4[%c0_2, %c0_3] : memref<1x256xf32, #tpu.memory_space<vmem>>, vector<1x256xf32>
    %5 = vector.shape_cast %4 : vector<1x256xf32> to vector<1x256xf32>
    %6 = vector.broadcast %5 : vector<1x256xf32> to vector<8x256xf32>
    %7 = tpu.iota {dimensions = array<i32: 1>} : vector<8x128xi32>
    %c96_i32 = arith.constant 96 : i32
    %8 = vector.broadcast %c96_i32 : i32 to vector<8x128xi32>
    %9 = arith.cmpi slt, %7, %8 : vector<8x128xi32>
    %c0_4 = arith.constant 0 : index
    %c0_5 = arith.constant 0 : index
    %10 = vector.load %arg9[%c0_4, %c0_5] : memref<8x64xf32, #tpu.memory_space<vmem>>, vector<8x64xf32>
    %c0_6 = arith.constant 0 : index
    %c0_7 = arith.constant 0 : index
    %11 = vector.load %arg10[%c0_6, %c0_7] : memref<8x64xf32, #tpu.memory_space<vmem>>, vector<8x64xf32>
    %c0_i32_8 = arith.constant 0 : i32
    %12 = arith.index_cast %c0_i32_8 : i32 to index
    %c0_9 = arith.constant 0 : index
    %c0_10 = arith.constant 0 : index
    %13 = vector.load %arg2[%12, %c0_9, %c0_10] : memref<8x8x32xf32, #tpu.memory_space<vmem>>, vector<1x8x32xf32>
    %14 = vector.shape_cast %13 : vector<1x8x32xf32> to vector<8x32xf32>
    %15 = tpu.concatenate %14, %10 in 1 : vector<8x32xf32>, vector<8x64xf32> -> vector<8x96xf32>
    %16 = arith.truncf %15 : vector<8x96xf32> to vector<8x96xbf16>
    %cst = arith.constant dense<0.000000e+00> : vector<8x256xf32>
    %17 = tpu.matmul %16, %3, %cst {dimension_numbers = #tpu.dot_dimension_numbers<[1], [0], [0], [1], [0, 0, 1, 1], [], []>} : vector<8x96xbf16>, vector<96x256xbf16>, vector<8x256xf32> -> vector<8x256xf32>
    %18 = arith.addf %17, %6 : vector<8x256xf32>
    %19 = vector.extract_strided_slice %18 {offsets = [0, 0], sizes = [8, 128], strides = [1, 1]} : vector<8x256xf32> to vector<8x128xf32>
    %20 = vector.extract_strided_slice %18 {offsets = [0, 128], sizes = [8, 128], strides = [1, 1]} : vector<8x256xf32> to vector<8x128xf32>
    %21 = arith.mulf %19, %19 : vector<8x128xf32>
    %22 = arith.mulf %20, %20 : vector<8x128xf32>
    %23 = arith.addf %21, %22 : vector<8x128xf32>
    %cst_11 = arith.constant 1.000000e-16 : f32
    %24 = vector.broadcast %cst_11 : f32 to vector<8x128xf32>
    %25 = arith.maximumf %23, %24 : vector<8x128xf32>
    %26 = math.rsqrt %25 : vector<8x128xf32>
    %27 = arith.mulf %23, %26 : vector<8x128xf32>
    %28 = arith.negf %27 : vector<8x128xf32>
    %29 = math.exp %28 : vector<8x128xf32>
    %cst_12 = arith.constant 1.000000e+00 : f32
    %30 = vector.broadcast %cst_12 : f32 to vector<8x128xf32>
    %31 = arith.addf %30, %29 : vector<8x128xf32>
    %32 = arith.divf %30, %31 : vector<8x128xf32>
    %33 = math.tanh %27 : vector<8x128xf32>
    %34 = arith.select %9, %32, %33 : vector<8x128xi1>, vector<8x128xf32>
    %35 = arith.mulf %34, %26 : vector<8x128xf32>
    %36 = arith.mulf %35, %19 : vector<8x128xf32>
    %37 = arith.mulf %35, %20 : vector<8x128xf32>
    %38 = vector.extract_strided_slice %36 {offsets = [0, 0], sizes = [8, 32], strides = [1, 1]} : vector<8x128xf32> to vector<8x32xf32>
    %39 = vector.extract_strided_slice %36 {offsets = [0, 32], sizes = [8, 32], strides = [1, 1]} : vector<8x128xf32> to vector<8x32xf32>
    %40 = vector.extract_strided_slice %36 {offsets = [0, 64], sizes = [8, 32], strides = [1, 1]} : vector<8x128xf32> to vector<8x32xf32>
    %41 = vector.extract_strided_slice %36 {offsets = [0, 96], sizes = [8, 32], strides = [1, 1]} : vector<8x128xf32> to vector<8x32xf32>
    %42 = vector.extract_strided_slice %37 {offsets = [0, 0], sizes = [8, 32], strides = [1, 1]} : vector<8x128xf32> to vector<8x32xf32>
    %43 = vector.extract_strided_slice %37 {offsets = [0, 32], sizes = [8, 32], strides = [1, 1]} : vector<8x128xf32> to vector<8x32xf32>
    %44 = vector.extract_strided_slice %37 {offsets = [0, 64], sizes = [8, 32], strides = [1, 1]} : vector<8x128xf32> to vector<8x32xf32>
    %45 = vector.extract_strided_slice %37 {offsets = [0, 96], sizes = [8, 32], strides = [1, 1]} : vector<8x128xf32> to vector<8x32xf32>
    %46 = vector.extract_strided_slice %11 {offsets = [0, 0], sizes = [8, 32], strides = [1, 1]} : vector<8x64xf32> to vector<8x32xf32>
    %47 = vector.extract_strided_slice %11 {offsets = [0, 32], sizes = [8, 32], strides = [1, 1]} : vector<8x64xf32> to vector<8x32xf32>
    %48 = arith.mulf %46, %39 : vector<8x32xf32>
    %49 = arith.mulf %38, %41 : vector<8x32xf32>
    %50 = arith.addf %48, %49 : vector<8x32xf32>
    %51 = arith.mulf %47, %43 : vector<8x32xf32>
    %52 = arith.mulf %42, %45 : vector<8x32xf32>
    %53 = arith.addf %51, %52 : vector<8x32xf32>
    %54 = arith.mulf %50, %50 : vector<8x32xf32>
    %55 = arith.mulf %53, %53 : vector<8x32xf32>
    %56 = arith.addf %54, %55 : vector<8x32xf32>
    %cst_13 = arith.constant 1.000000e-16 : f32
    %57 = vector.broadcast %cst_13 : f32 to vector<8x32xf32>
    %58 = arith.maximumf %56, %57 : vector<8x32xf32>
    %59 = math.rsqrt %58 : vector<8x32xf32>
    %60 = arith.mulf %56, %59 : vector<8x32xf32>
    %61 = math.tanh %60 : vector<8x32xf32>
    %62 = arith.mulf %61, %59 : vector<8x32xf32>
    %63 = arith.mulf %62, %50 : vector<8x32xf32>
    %64 = arith.mulf %62, %53 : vector<8x32xf32>
    %65 = arith.mulf %40, %63 : vector<8x32xf32>
    %66 = arith.mulf %44, %64 : vector<8x32xf32>
    %67 = arith.subf %65, %66 : vector<8x32xf32>
    %68 = arith.mulf %40, %64 : vector<8x32xf32>
    %69 = arith.mulf %44, %63 : vector<8x32xf32>
    %70 = arith.addf %68, %69 : vector<8x32xf32>
    %71 = tpu.concatenate %67, %70 in 1 : vector<8x32xf32>, vector<8x32xf32> -> vector<8x64xf32>
    %72 = tpu.concatenate %50, %53 in 1 : vector<8x32xf32>, vector<8x32xf32> -> vector<8x64xf32>
    %73 = arith.index_cast %c0_i32_8 : i32 to index
    %c0_14 = arith.constant 0 : index
    %c0_15 = arith.constant 0 : index
    %74 = vector.load %arg7[%73, %c0_14, %c0_15] : memref<8x8x64xf32, #tpu.memory_space<vmem>>, vector<1x8x64xf32>
    %75 = vector.shape_cast %74 : vector<1x8x64xf32> to vector<8x64xf32>
    %76 = vector.shape_cast %71 : vector<8x64xf32> to vector<1x8x64xf32>
    tpu.vector_store %arg7[%73, %c0_14, %c0_15], %76 {strides = array<i32>} : memref<8x8x64xf32, #tpu.memory_space<vmem>>, vector<1x8x64xf32>,
    %c1_i32 = arith.constant 1 : i32
    %77 = arith.index_cast %c1_i32 : i32 to index
    %c0_16 = arith.constant 0 : index
    %c0_17 = arith.constant 0 : index
    %78 = vector.load %arg2[%77, %c0_16, %c0_17] : memref<8x8x32xf32, #tpu.memory_space<vmem>>, vector<1x8x32xf32>
    %79 = vector.shape_cast %78 : vector<1x8x32xf32> to vector<8x32xf32>
    %80 = tpu.concatenate %79, %71 in 1 : vector<8x32xf32>, vector<8x64xf32> -> vector<8x96xf32>
    %81 = arith.truncf %80 : vector<8x96xf32> to vector<8x96xbf16>
    %cst_18 = arith.constant dense<0.000000e+00> : vector<8x256xf32>
    %82 = tpu.matmul %81, %3, %cst_18 {dimension_numbers = #tpu.dot_dimension_numbers<[1], [0], [0], [1], [0, 0, 1, 1], [], []>} : vector<8x96xbf16>, vector<96x256xbf16>, vector<8x256xf32> -> vector<8x256xf32>
    %83 = arith.addf %82, %6 : vector<8x256xf32>
    %84 = vector.extract_strided_slice %83 {offsets = [0, 0], sizes = [8, 128], strides = [1, 1]} : vector<8x256xf32> to vector<8x128xf32>
    %85 = vector.extract_strided_slice %83 {offsets = [0, 128], sizes = [8, 128], strides = [1, 1]} : vector<8x256xf32> to vector<8x128xf32>
    %86 = arith.mulf %84, %84 : vector<8x128xf32>
    %87 = arith.mulf %85, %85 : vector<8x128xf32>
    %88 = arith.addf %86, %87 : vector<8x128xf32>
    %cst_19 = arith.constant 1.000000e-16 : f32
    %89 = vector.broadcast %cst_19 : f32 to vector<8x128xf32>
    %90 = arith.maximumf %88, %89 : vector<8x128xf32>
    %91 = math.rsqrt %90 : vector<8x128xf32>
    %92 = arith.mulf %88, %91 : vector<8x128xf32>
    %93 = arith.negf %92 : vector<8x128xf32>
    %94 = math.exp %93 : vector<8x128xf32>
    %cst_20 = arith.constant 1.000000e+00 : f32
    %95 = vector.broadcast %cst_20 : f32 to vector<8x128xf32>
    %96 = arith.addf %95, %94 : vector<8x128xf32>
    %97 = arith.divf %95, %96 : vector<8x128xf32>
    %98 = math.tanh %92 : vector<8x128xf32>
    %99 = arith.select %9, %97, %98 : vector<8x128xi1>, vector<8x128xf32>
    %100 = arith.mulf %99, %91 : vector<8x128xf32>
    %101 = arith.mulf %100, %84 : vector<8x128xf32>
    %102 = arith.mulf %100, %85 : vector<8x128xf32>
    %103 = vector.extract_strided_slice %101 {offsets = [0, 0], sizes = [8, 32], strides = [1, 1]} : vector<8x128xf32> to vector<8x32xf32>
    %104 = vector.extract_strided_slice %101 {offsets = [0, 32], sizes = [8, 32], strides = [1, 1]} : vector<8x128xf32> to vector<8x32xf32>
    %105 = vector.extract_strided_slice %101 {offsets = [0, 64], sizes = [8, 32], strides = [1, 1]} : vector<8x128xf32> to vector<8x32xf32>
    %106 = vector.extract_strided_slice %101 {offsets = [0, 96], sizes = [8, 32], strides = [1, 1]} : vector<8x128xf32> to vector<8x32xf32>
    %107 = vector.extract_strided_slice %102 {offsets = [0, 0], sizes = [8, 32], strides = [1, 1]} : vector<8x128xf32> to vector<8x32xf32>
    %108 = vector.extract_strided_slice %102 {offsets = [0, 32], sizes = [8, 32], strides = [1, 1]} : vector<8x128xf32> to vector<8x32xf32>
    %109 = vector.extract_strided_slice %102 {offsets = [0, 64], sizes = [8, 32], strides = [1, 1]} : vector<8x128xf32> to vector<8x32xf32>
    %110 = vector.extract_strided_slice %102 {offsets = [0, 96], sizes = [8, 32], strides = [1, 1]} : vector<8x128xf32> to vector<8x32xf32>
    %111 = vector.extract_strided_slice %72 {offsets = [0, 0], sizes = [8, 32], strides = [1, 1]} : vector<8x64xf32> to vector<8x32xf32>
    %112 = vector.extract_strided_slice %72 {offsets = [0, 32], sizes = [8, 32], strides = [1, 1]} : vector<8x64xf32> to vector<8x32xf32>
    %113 = arith.mulf %111, %104 : vector<8x32xf32>
    %114 = arith.mulf %103, %106 : vector<8x32xf32>
    %115 = arith.addf %113, %114 : vector<8x32xf32>
    %116 = arith.mulf %112, %108 : vector<8x32xf32>
    %117 = arith.mulf %107, %110 : vector<8x32xf32>
    %118 = arith.addf %116, %117 : vector<8x32xf32>
    %119 = arith.mulf %115, %115 : vector<8x32xf32>
    %120 = arith.mulf %118, %118 : vector<8x32xf32>
    %121 = arith.addf %119, %120 : vector<8x32xf32>
    %cst_21 = arith.constant 1.000000e-16 : f32
    %122 = vector.broadcast %cst_21 : f32 to vector<8x32xf32>
    %123 = arith.maximumf %121, %122 : vector<8x32xf32>
    %124 = math.rsqrt %123 : vector<8x32xf32>
    %125 = arith.mulf %121, %124 : vector<8x32xf32>
    %126 = math.tanh %125 : vector<8x32xf32>
    %127 = arith.mulf %126, %124 : vector<8x32xf32>
    %128 = arith.mulf %127, %115 : vector<8x32xf32>
    %129 = arith.mulf %127, %118 : vector<8x32xf32>
    %130 = arith.mulf %105, %128 : vector<8x32xf32>
    %131 = arith.mulf %109, %129 : vector<8x32xf32>
    %132 = arith.subf %130, %131 : vector<8x32xf32>
    %133 = arith.mulf %105, %129 : vector<8x32xf32>
    %134 = arith.mulf %109, %128 : vector<8x32xf32>
    %135 = arith.addf %133, %134 : vector<8x32xf32>
    %136 = tpu.concatenate %132, %135 in 1 : vector<8x32xf32>, vector<8x32xf32> -> vector<8x64xf32>
    %137 = tpu.concatenate %115, %118 in 1 : vector<8x32xf32>, vector<8x32xf32> -> vector<8x64xf32>
    %138 = arith.index_cast %c1_i32 : i32 to index
    %c0_22 = arith.constant 0 : index
    %c0_23 = arith.constant 0 : index
    %139 = vector.load %arg7[%138, %c0_22, %c0_23] : memref<8x8x64xf32, #tpu.memory_space<vmem>>, vector<1x8x64xf32>
    %140 = vector.shape_cast %139 : vector<1x8x64xf32> to vector<8x64xf32>
    %141 = vector.shape_cast %136 : vector<8x64xf32> to vector<1x8x64xf32>
    tpu.vector_store %arg7[%138, %c0_22, %c0_23], %141 {strides = array<i32>} : memref<8x8x64xf32, #tpu.memory_space<vmem>>, vector<1x8x64xf32>,
    %c2_i32 = arith.constant 2 : i32
    %142 = arith.index_cast %c2_i32 : i32 to index
    %c0_24 = arith.constant 0 : index
    %c0_25 = arith.constant 0 : index
    %143 = vector.load %arg2[%142, %c0_24, %c0_25] : memref<8x8x32xf32, #tpu.memory_space<vmem>>, vector<1x8x32xf32>
    %144 = vector.shape_cast %143 : vector<1x8x32xf32> to vector<8x32xf32>
    %145 = tpu.concatenate %144, %136 in 1 : vector<8x32xf32>, vector<8x64xf32> -> vector<8x96xf32>
    %146 = arith.truncf %145 : vector<8x96xf32> to vector<8x96xbf16>
    %cst_26 = arith.constant dense<0.000000e+00> : vector<8x256xf32>
    %147 = tpu.matmul %146, %3, %cst_26 {dimension_numbers = #tpu.dot_dimension_numbers<[1], [0], [0], [1], [0, 0, 1, 1], [], []>} : vector<8x96xbf16>, vector<96x256xbf16>, vector<8x256xf32> -> vector<8x256xf32>
    %148 = arith.addf %147, %6 : vector<8x256xf32>
    %149 = vector.extract_strided_slice %148 {offsets = [0, 0], sizes = [8, 128], strides = [1, 1]} : vector<8x256xf32> to vector<8x128xf32>
    %150 = vector.extract_strided_slice %148 {offsets = [0, 128], sizes = [8, 128], strides = [1, 1]} : vector<8x256xf32> to vector<8x128xf32>
    %151 = arith.mulf %149, %149 : vector<8x128xf32>
    %152 = arith.mulf %150, %150 : vector<8x128xf32>
    %153 = arith.addf %151, %152 : vector<8x128xf32>
    %cst_27 = arith.constant 1.000000e-16 : f32
    %154 = vector.broadcast %cst_27 : f32 to vector<8x128xf32>
    %155 = arith.maximumf %153, %154 : vector<8x128xf32>
    %156 = math.rsqrt %155 : vector<8x128xf32>
    %157 = arith.mulf %153, %156 : vector<8x128xf32>
    %158 = arith.negf %157 : vector<8x128xf32>
    %159 = math.exp %158 : vector<8x128xf32>
    %cst_28 = arith.constant 1.000000e+00 : f32
    %160 = vector.broadcast %cst_28 : f32 to vector<8x128xf32>
    %161 = arith.addf %160, %159 : vector<8x128xf32>
    %162 = arith.divf %160, %161 : vector<8x128xf32>
    %163 = math.tanh %157 : vector<8x128xf32>
    %164 = arith.select %9, %162, %163 : vector<8x128xi1>, vector<8x128xf32>
    %165 = arith.mulf %164, %156 : vector<8x128xf32>
    %166 = arith.mulf %165, %149 : vector<8x128xf32>
    %167 = arith.mulf %165, %150 : vector<8x128xf32>
    %168 = vector.extract_strided_slice %166 {offsets = [0, 0], sizes = [8, 32], strides = [1, 1]} : vector<8x128xf32> to vector<8x32xf32>
    %169 = vector.extract_strided_slice %166 {offsets = [0, 32], sizes = [8, 32], strides = [1, 1]} : vector<8x128xf32> to vector<8x32xf32>
    %170 = vector.extract_strided_slice %166 {offsets = [0, 64], sizes = [8, 32], strides = [1, 1]} : vector<8x128xf32> to vector<8x32xf32>
    %171 = vector.extract_strided_slice %166 {offsets = [0, 96], sizes = [8, 32], strides = [1, 1]} : vector<8x128xf32> to vector<8x32xf32>
    %172 = vector.extract_strided_slice %167 {offsets = [0, 0], sizes = [8, 32], strides = [1, 1]} : vector<8x128xf32> to vector<8x32xf32>
    %173 = vector.extract_strided_slice %167 {offsets = [0, 32], sizes = [8, 32], strides = [1, 1]} : vector<8x128xf32> to vector<8x32xf32>
    %174 = vector.extract_strided_slice %167 {offsets = [0, 64], sizes = [8, 32], strides = [1, 1]} : vector<8x128xf32> to vector<8x32xf32>
    %175 = vector.extract_strided_slice %167 {offsets = [0, 96], sizes = [8, 32], strides = [1, 1]} : vector<8x128xf32> to vector<8x32xf32>
    %176 = vector.extract_strided_slice %137 {offsets = [0, 0], sizes = [8, 32], strides = [1, 1]} : vector<8x64xf32> to vector<8x32xf32>
    %177 = vector.extract_strided_slice %137 {offsets = [0, 32], sizes = [8, 32], strides = [1, 1]} : vector<8x64xf32> to vector<8x32xf32>
    %178 = arith.mulf %176, %169 : vector<8x32xf32>
    %179 = arith.mulf %168, %171 : vector<8x32xf32>
    %180 = arith.addf %178, %179 : vector<8x32xf32>
    %181 = arith.mulf %177, %173 : vector<8x32xf32>
    %182 = arith.mulf %172, %175 : vector<8x32xf32>
    %183 = arith.addf %181, %182 : vector<8x32xf32>
    %184 = arith.mulf %180, %180 : vector<8x32xf32>
    %185 = arith.mulf %183, %183 : vector<8x32xf32>
    %186 = arith.addf %184, %185 : vector<8x32xf32>
    %cst_29 = arith.constant 1.000000e-16 : f32
    %187 = vector.broadcast %cst_29 : f32 to vector<8x32xf32>
    %188 = arith.maximumf %186, %187 : vector<8x32xf32>
    %189 = math.rsqrt %188 : vector<8x32xf32>
    %190 = arith.mulf %186, %189 : vector<8x32xf32>
    %191 = math.tanh %190 : vector<8x32xf32>
    %192 = arith.mulf %191, %189 : vector<8x32xf32>
    %193 = arith.mulf %192, %180 : vector<8x32xf32>
    %194 = arith.mulf %192, %183 : vector<8x32xf32>
    %195 = arith.mulf %170, %193 : vector<8x32xf32>
    %196 = arith.mulf %174, %194 : vector<8x32xf32>
    %197 = arith.subf %195, %196 : vector<8x32xf32>
    %198 = arith.mulf %170, %194 : vector<8x32xf32>
    %199 = arith.mulf %174, %193 : vector<8x32xf32>
    %200 = arith.addf %198, %199 : vector<8x32xf32>
    %201 = tpu.concatenate %197, %200 in 1 : vector<8x32xf32>, vector<8x32xf32> -> vector<8x64xf32>
    %202 = tpu.concatenate %180, %183 in 1 : vector<8x32xf32>, vector<8x32xf32> -> vector<8x64xf32>
    %203 = arith.index_cast %c2_i32 : i32 to index
    %c0_30 = arith.constant 0 : index
    %c0_31 = arith.constant 0 : index
    %204 = vector.load %arg7[%203, %c0_30, %c0_31] : memref<8x8x64xf32, #tpu.memory_space<vmem>>, vector<1x8x64xf32>
    %205 = vector.shape_cast %204 : vector<1x8x64xf32> to vector<8x64xf32>
    %206 = vector.shape_cast %201 : vector<8x64xf32> to vector<1x8x64xf32>
    tpu.vector_store %arg7[%203, %c0_30, %c0_31], %206 {strides = array<i32>} : memref<8x8x64xf32, #tpu.memory_space<vmem>>, vector<1x8x64xf32>,
    %c3_i32 = arith.constant 3 : i32
    %207 = arith.index_cast %c3_i32 : i32 to index
    %c0_32 = arith.constant 0 : index
    %c0_33 = arith.constant 0 : index
    %208 = vector.load %arg2[%207, %c0_32, %c0_33] : memref<8x8x32xf32, #tpu.memory_space<vmem>>, vector<1x8x32xf32>
    %209 = vector.shape_cast %208 : vector<1x8x32xf32> to vector<8x32xf32>
    %210 = tpu.concatenate %209, %201 in 1 : vector<8x32xf32>, vector<8x64xf32> -> vector<8x96xf32>
    %211 = arith.truncf %210 : vector<8x96xf32> to vector<8x96xbf16>
    %cst_34 = arith.constant dense<0.000000e+00> : vector<8x256xf32>
    %212 = tpu.matmul %211, %3, %cst_34 {dimension_numbers = #tpu.dot_dimension_numbers<[1], [0], [0], [1], [0, 0, 1, 1], [], []>} : vector<8x96xbf16>, vector<96x256xbf16>, vector<8x256xf32> -> vector<8x256xf32>
    %213 = arith.addf %212, %6 : vector<8x256xf32>
    %214 = vector.extract_strided_slice %213 {offsets = [0, 0], sizes = [8, 128], strides = [1, 1]} : vector<8x256xf32> to vector<8x128xf32>
    %215 = vector.extract_strided_slice %213 {offsets = [0, 128], sizes = [8, 128], strides = [1, 1]} : vector<8x256xf32> to vector<8x128xf32>
    %216 = arith.mulf %214, %214 : vector<8x128xf32>
    %217 = arith.mulf %215, %215 : vector<8x128xf32>
    %218 = arith.addf %216, %217 : vector<8x128xf32>
    %cst_35 = arith.constant 1.000000e-16 : f32
    %219 = vector.broadcast %cst_35 : f32 to vector<8x128xf32>
    %220 = arith.maximumf %218, %219 : vector<8x128xf32>
    %221 = math.rsqrt %220 : vector<8x128xf32>
    %222 = arith.mulf %218, %221 : vector<8x128xf32>
    %223 = arith.negf %222 : vector<8x128xf32>
    %224 = math.exp %223 : vector<8x128xf32>
    %cst_36 = arith.constant 1.000000e+00 : f32
    %225 = vector.broadcast %cst_36 : f32 to vector<8x128xf32>
    %226 = arith.addf %225, %224 : vector<8x128xf32>
    %227 = arith.divf %225, %226 : vector<8x128xf32>
    %228 = math.tanh %222 : vector<8x128xf32>
    %229 = arith.select %9, %227, %228 : vector<8x128xi1>, vector<8x128xf32>
    %230 = arith.mulf %229, %221 : vector<8x128xf32>
    %231 = arith.mulf %230, %214 : vector<8x128xf32>
    %232 = arith.mulf %230, %215 : vector<8x128xf32>
    %233 = vector.extract_strided_slice %231 {offsets = [0, 0], sizes = [8, 32], strides = [1, 1]} : vector<8x128xf32> to vector<8x32xf32>
    %234 = vector.extract_strided_slice %231 {offsets = [0, 32], sizes = [8, 32], strides = [1, 1]} : vector<8x128xf32> to vector<8x32xf32>
    %235 = vector.extract_strided_slice %231 {offsets = [0, 64], sizes = [8, 32], strides = [1, 1]} : vector<8x128xf32> to vector<8x32xf32>
    %236 = vector.extract_strided_slice %231 {offsets = [0, 96], sizes = [8, 32], strides = [1, 1]} : vector<8x128xf32> to vector<8x32xf32>
    %237 = vector.extract_strided_slice %232 {offsets = [0, 0], sizes = [8, 32], strides = [1, 1]} : vector<8x128xf32> to vector<8x32xf32>
    %238 = vector.extract_strided_slice %232 {offsets = [0, 32], sizes = [8, 32], strides = [1, 1]} : vector<8x128xf32> to vector<8x32xf32>
    %239 = vector.extract_strided_slice %232 {offsets = [0, 64], sizes = [8, 32], strides = [1, 1]} : vector<8x128xf32> to vector<8x32xf32>
    %240 = vector.extract_strided_slice %232 {offsets = [0, 96], sizes = [8, 32], strides = [1, 1]} : vector<8x128xf32> to vector<8x32xf32>
    %241 = vector.extract_strided_slice %202 {offsets = [0, 0], sizes = [8, 32], strides = [1, 1]} : vector<8x64xf32> to vector<8x32xf32>
    %242 = vector.extract_strided_slice %202 {offsets = [0, 32], sizes = [8, 32], strides = [1, 1]} : vector<8x64xf32> to vector<8x32xf32>
    %243 = arith.mulf %241, %234 : vector<8x32xf32>
    %244 = arith.mulf %233, %236 : vector<8x32xf32>
    %245 = arith.addf %243, %244 : vector<8x32xf32>
    %246 = arith.mulf %242, %238 : vector<8x32xf32>
    %247 = arith.mulf %237, %240 : vector<8x32xf32>
    %248 = arith.addf %246, %247 : vector<8x32xf32>
    %249 = arith.mulf %245, %245 : vector<8x32xf32>
    %250 = arith.mulf %248, %248 : vector<8x32xf32>
    %251 = arith.addf %249, %250 : vector<8x32xf32>
    %cst_37 = arith.constant 1.000000e-16 : f32
    %252 = vector.broadcast %cst_37 : f32 to vector<8x32xf32>
    %253 = arith.maximumf %251, %252 : vector<8x32xf32>
    %254 = math.rsqrt %253 : vector<8x32xf32>
    %255 = arith.mulf %251, %254 : vector<8x32xf32>
    %256 = math.tanh %255 : vector<8x32xf32>
    %257 = arith.mulf %256, %254 : vector<8x32xf32>
    %258 = arith.mulf %257, %245 : vector<8x32xf32>
    %259 = arith.mulf %257, %248 : vector<8x32xf32>
    %260 = arith.mulf %235, %258 : vector<8x32xf32>
    %261 = arith.mulf %239, %259 : vector<8x32xf32>
    %262 = arith.subf %260, %261 : vector<8x32xf32>
    %263 = arith.mulf %235, %259 : vector<8x32xf32>
    %264 = arith.mulf %239, %258 : vector<8x32xf32>
    %265 = arith.addf %263, %264 : vector<8x32xf32>
    %266 = tpu.concatenate %262, %265 in 1 : vector<8x32xf32>, vector<8x32xf32> -> vector<8x64xf32>
    %267 = tpu.concatenate %245, %248 in 1 : vector<8x32xf32>, vector<8x32xf32> -> vector<8x64xf32>
    %268 = arith.index_cast %c3_i32 : i32 to index
    %c0_38 = arith.constant 0 : index
    %c0_39 = arith.constant 0 : index
    %269 = vector.load %arg7[%268, %c0_38, %c0_39] : memref<8x8x64xf32, #tpu.memory_space<vmem>>, vector<1x8x64xf32>
    %270 = vector.shape_cast %269 : vector<1x8x64xf32> to vector<8x64xf32>
    %271 = vector.shape_cast %266 : vector<8x64xf32> to vector<1x8x64xf32>
    tpu.vector_store %arg7[%268, %c0_38, %c0_39], %271 {strides = array<i32>} : memref<8x8x64xf32, #tpu.memory_space<vmem>>, vector<1x8x64xf32>,
    %c4_i32 = arith.constant 4 : i32
    %272 = arith.index_cast %c4_i32 : i32 to index
    %c0_40 = arith.constant 0 : index
    %c0_41 = arith.constant 0 : index
    %273 = vector.load %arg2[%272, %c0_40, %c0_41] : memref<8x8x32xf32, #tpu.memory_space<vmem>>, vector<1x8x32xf32>
    %274 = vector.shape_cast %273 : vector<1x8x32xf32> to vector<8x32xf32>
    %275 = tpu.concatenate %274, %266 in 1 : vector<8x32xf32>, vector<8x64xf32> -> vector<8x96xf32>
    %276 = arith.truncf %275 : vector<8x96xf32> to vector<8x96xbf16>
    %cst_42 = arith.constant dense<0.000000e+00> : vector<8x256xf32>
    %277 = tpu.matmul %276, %3, %cst_42 {dimension_numbers = #tpu.dot_dimension_numbers<[1], [0], [0], [1], [0, 0, 1, 1], [], []>} : vector<8x96xbf16>, vector<96x256xbf16>, vector<8x256xf32> -> vector<8x256xf32>
    %278 = arith.addf %277, %6 : vector<8x256xf32>
    %279 = vector.extract_strided_slice %278 {offsets = [0, 0], sizes = [8, 128], strides = [1, 1]} : vector<8x256xf32> to vector<8x128xf32>
    %280 = vector.extract_strided_slice %278 {offsets = [0, 128], sizes = [8, 128], strides = [1, 1]} : vector<8x256xf32> to vector<8x128xf32>
    %281 = arith.mulf %279, %279 : vector<8x128xf32>
    %282 = arith.mulf %280, %280 : vector<8x128xf32>
    %283 = arith.addf %281, %282 : vector<8x128xf32>
    %cst_43 = arith.constant 1.000000e-16 : f32
    %284 = vector.broadcast %cst_43 : f32 to vector<8x128xf32>
    %285 = arith.maximumf %283, %284 : vector<8x128xf32>
    %286 = math.rsqrt %285 : vector<8x128xf32>
    %287 = arith.mulf %283, %286 : vector<8x128xf32>
    %288 = arith.negf %287 : vector<8x128xf32>
    %289 = math.exp %288 : vector<8x128xf32>
    %cst_44 = arith.constant 1.000000e+00 : f32
    %290 = vector.broadcast %cst_44 : f32 to vector<8x128xf32>
    %291 = arith.addf %290, %289 : vector<8x128xf32>
    %292 = arith.divf %290, %291 : vector<8x128xf32>
    %293 = math.tanh %287 : vector<8x128xf32>
    %294 = arith.select %9, %292, %293 : vector<8x128xi1>, vector<8x128xf32>
    %295 = arith.mulf %294, %286 : vector<8x128xf32>
    %296 = arith.mulf %295, %279 : vector<8x128xf32>
    %297 = arith.mulf %295, %280 : vector<8x128xf32>
    %298 = vector.extract_strided_slice %296 {offsets = [0, 0], sizes = [8, 32], strides = [1, 1]} : vector<8x128xf32> to vector<8x32xf32>
    %299 = vector.extract_strided_slice %296 {offsets = [0, 32], sizes = [8, 32], strides = [1, 1]} : vector<8x128xf32> to vector<8x32xf32>
    %300 = vector.extract_strided_slice %296 {offsets = [0, 64], sizes = [8, 32], strides = [1, 1]} : vector<8x128xf32> to vector<8x32xf32>
    %301 = vector.extract_strided_slice %296 {offsets = [0, 96], sizes = [8, 32], strides = [1, 1]} : vector<8x128xf32> to vector<8x32xf32>
    %302 = vector.extract_strided_slice %297 {offsets = [0, 0], sizes = [8, 32], strides = [1, 1]} : vector<8x128xf32> to vector<8x32xf32>
    %303 = vector.extract_strided_slice %297 {offsets = [0, 32], sizes = [8, 32], strides = [1, 1]} : vector<8x128xf32> to vector<8x32xf32>
    %304 = vector.extract_strided_slice %297 {offsets = [0, 64], sizes = [8, 32], strides = [1, 1]} : vector<8x128xf32> to vector<8x32xf32>
    %305 = vector.extract_strided_slice %297 {offsets = [0, 96], sizes = [8, 32], strides = [1, 1]} : vector<8x128xf32> to vector<8x32xf32>
    %306 = vector.extract_strided_slice %267 {offsets = [0, 0], sizes = [8, 32], strides = [1, 1]} : vector<8x64xf32> to vector<8x32xf32>
    %307 = vector.extract_strided_slice %267 {offsets = [0, 32], sizes = [8, 32], strides = [1, 1]} : vector<8x64xf32> to vector<8x32xf32>
    %308 = arith.mulf %306, %299 : vector<8x32xf32>
    %309 = arith.mulf %298, %301 : vector<8x32xf32>
    %310 = arith.addf %308, %309 : vector<8x32xf32>
    %311 = arith.mulf %307, %303 : vector<8x32xf32>
    %312 = arith.mulf %302, %305 : vector<8x32xf32>
    %313 = arith.addf %311, %312 : vector<8x32xf32>
    %314 = arith.mulf %310, %310 : vector<8x32xf32>
    %315 = arith.mulf %313, %313 : vector<8x32xf32>
    %316 = arith.addf %314, %315 : vector<8x32xf32>
    %cst_45 = arith.constant 1.000000e-16 : f32
    %317 = vector.broadcast %cst_45 : f32 to vector<8x32xf32>
    %318 = arith.maximumf %316, %317 : vector<8x32xf32>
    %319 = math.rsqrt %318 : vector<8x32xf32>
    %320 = arith.mulf %316, %319 : vector<8x32xf32>
    %321 = math.tanh %320 : vector<8x32xf32>
    %322 = arith.mulf %321, %319 : vector<8x32xf32>
    %323 = arith.mulf %322, %310 : vector<8x32xf32>
    %324 = arith.mulf %322, %313 : vector<8x32xf32>
    %325 = arith.mulf %300, %323 : vector<8x32xf32>
    %326 = arith.mulf %304, %324 : vector<8x32xf32>
    %327 = arith.subf %325, %326 : vector<8x32xf32>
    %328 = arith.mulf %300, %324 : vector<8x32xf32>
    %329 = arith.mulf %304, %323 : vector<8x32xf32>
    %330 = arith.addf %328, %329 : vector<8x32xf32>
    %331 = tpu.concatenate %327, %330 in 1 : vector<8x32xf32>, vector<8x32xf32> -> vector<8x64xf32>
    %332 = tpu.concatenate %310, %313 in 1 : vector<8x32xf32>, vector<8x32xf32> -> vector<8x64xf32>
    %333 = arith.index_cast %c4_i32 : i32 to index
    %c0_46 = arith.constant 0 : index
    %c0_47 = arith.constant 0 : index
    %334 = vector.load %arg7[%333, %c0_46, %c0_47] : memref<8x8x64xf32, #tpu.memory_space<vmem>>, vector<1x8x64xf32>
    %335 = vector.shape_cast %334 : vector<1x8x64xf32> to vector<8x64xf32>
    %336 = vector.shape_cast %331 : vector<8x64xf32> to vector<1x8x64xf32>
    tpu.vector_store %arg7[%333, %c0_46, %c0_47], %336 {strides = array<i32>} : memref<8x8x64xf32, #tpu.memory_space<vmem>>, vector<1x8x64xf32>,
    %c5_i32 = arith.constant 5 : i32
    %337 = arith.index_cast %c5_i32 : i32 to index
    %c0_48 = arith.constant 0 : index
    %c0_49 = arith.constant 0 : index
    %338 = vector.load %arg2[%337, %c0_48, %c0_49] : memref<8x8x32xf32, #tpu.memory_space<vmem>>, vector<1x8x32xf32>
    %339 = vector.shape_cast %338 : vector<1x8x32xf32> to vector<8x32xf32>
    %340 = tpu.concatenate %339, %331 in 1 : vector<8x32xf32>, vector<8x64xf32> -> vector<8x96xf32>
    %341 = arith.truncf %340 : vector<8x96xf32> to vector<8x96xbf16>
    %cst_50 = arith.constant dense<0.000000e+00> : vector<8x256xf32>
    %342 = tpu.matmul %341, %3, %cst_50 {dimension_numbers = #tpu.dot_dimension_numbers<[1], [0], [0], [1], [0, 0, 1, 1], [], []>} : vector<8x96xbf16>, vector<96x256xbf16>, vector<8x256xf32> -> vector<8x256xf32>
    %343 = arith.addf %342, %6 : vector<8x256xf32>
    %344 = vector.extract_strided_slice %343 {offsets = [0, 0], sizes = [8, 128], strides = [1, 1]} : vector<8x256xf32> to vector<8x128xf32>
    %345 = vector.extract_strided_slice %343 {offsets = [0, 128], sizes = [8, 128], strides = [1, 1]} : vector<8x256xf32> to vector<8x128xf32>
    %346 = arith.mulf %344, %344 : vector<8x128xf32>
    %347 = arith.mulf %345, %345 : vector<8x128xf32>
    %348 = arith.addf %346, %347 : vector<8x128xf32>
    %cst_51 = arith.constant 1.000000e-16 : f32
    %349 = vector.broadcast %cst_51 : f32 to vector<8x128xf32>
    %350 = arith.maximumf %348, %349 : vector<8x128xf32>
    %351 = math.rsqrt %350 : vector<8x128xf32>
    %352 = arith.mulf %348, %351 : vector<8x128xf32>
    %353 = arith.negf %352 : vector<8x128xf32>
    %354 = math.exp %353 : vector<8x128xf32>
    %cst_52 = arith.constant 1.000000e+00 : f32
    %355 = vector.broadcast %cst_52 : f32 to vector<8x128xf32>
    %356 = arith.addf %355, %354 : vector<8x128xf32>
    %357 = arith.divf %355, %356 : vector<8x128xf32>
    %358 = math.tanh %352 : vector<8x128xf32>
    %359 = arith.select %9, %357, %358 : vector<8x128xi1>, vector<8x128xf32>
    %360 = arith.mulf %359, %351 : vector<8x128xf32>
    %361 = arith.mulf %360, %344 : vector<8x128xf32>
    %362 = arith.mulf %360, %345 : vector<8x128xf32>
    %363 = vector.extract_strided_slice %361 {offsets = [0, 0], sizes = [8, 32], strides = [1, 1]} : vector<8x128xf32> to vector<8x32xf32>
    %364 = vector.extract_strided_slice %361 {offsets = [0, 32], sizes = [8, 32], strides = [1, 1]} : vector<8x128xf32> to vector<8x32xf32>
    %365 = vector.extract_strided_slice %361 {offsets = [0, 64], sizes = [8, 32], strides = [1, 1]} : vector<8x128xf32> to vector<8x32xf32>
    %366 = vector.extract_strided_slice %361 {offsets = [0, 96], sizes = [8, 32], strides = [1, 1]} : vector<8x128xf32> to vector<8x32xf32>
    %367 = vector.extract_strided_slice %362 {offsets = [0, 0], sizes = [8, 32], strides = [1, 1]} : vector<8x128xf32> to vector<8x32xf32>
    %368 = vector.extract_strided_slice %362 {offsets = [0, 32], sizes = [8, 32], strides = [1, 1]} : vector<8x128xf32> to vector<8x32xf32>
    %369 = vector.extract_strided_slice %362 {offsets = [0, 64], sizes = [8, 32], strides = [1, 1]} : vector<8x128xf32> to vector<8x32xf32>
    %370 = vector.extract_strided_slice %362 {offsets = [0, 96], sizes = [8, 32], strides = [1, 1]} : vector<8x128xf32> to vector<8x32xf32>
    %371 = vector.extract_strided_slice %332 {offsets = [0, 0], sizes = [8, 32], strides = [1, 1]} : vector<8x64xf32> to vector<8x32xf32>
    %372 = vector.extract_strided_slice %332 {offsets = [0, 32], sizes = [8, 32], strides = [1, 1]} : vector<8x64xf32> to vector<8x32xf32>
    %373 = arith.mulf %371, %364 : vector<8x32xf32>
    %374 = arith.mulf %363, %366 : vector<8x32xf32>
    %375 = arith.addf %373, %374 : vector<8x32xf32>
    %376 = arith.mulf %372, %368 : vector<8x32xf32>
    %377 = arith.mulf %367, %370 : vector<8x32xf32>
    %378 = arith.addf %376, %377 : vector<8x32xf32>
    %379 = arith.mulf %375, %375 : vector<8x32xf32>
    %380 = arith.mulf %378, %378 : vector<8x32xf32>
    %381 = arith.addf %379, %380 : vector<8x32xf32>
    %cst_53 = arith.constant 1.000000e-16 : f32
    %382 = vector.broadcast %cst_53 : f32 to vector<8x32xf32>
    %383 = arith.maximumf %381, %382 : vector<8x32xf32>
    %384 = math.rsqrt %383 : vector<8x32xf32>
    %385 = arith.mulf %381, %384 : vector<8x32xf32>
    %386 = math.tanh %385 : vector<8x32xf32>
    %387 = arith.mulf %386, %384 : vector<8x32xf32>
    %388 = arith.mulf %387, %375 : vector<8x32xf32>
    %389 = arith.mulf %387, %378 : vector<8x32xf32>
    %390 = arith.mulf %365, %388 : vector<8x32xf32>
    %391 = arith.mulf %369, %389 : vector<8x32xf32>
    %392 = arith.subf %390, %391 : vector<8x32xf32>
    %393 = arith.mulf %365, %389 : vector<8x32xf32>
    %394 = arith.mulf %369, %388 : vector<8x32xf32>
    %395 = arith.addf %393, %394 : vector<8x32xf32>
    %396 = tpu.concatenate %392, %395 in 1 : vector<8x32xf32>, vector<8x32xf32> -> vector<8x64xf32>
    %397 = tpu.concatenate %375, %378 in 1 : vector<8x32xf32>, vector<8x32xf32> -> vector<8x64xf32>
    %398 = arith.index_cast %c5_i32 : i32 to index
    %c0_54 = arith.constant 0 : index
    %c0_55 = arith.constant 0 : index
    %399 = vector.load %arg7[%398, %c0_54, %c0_55] : memref<8x8x64xf32, #tpu.memory_space<vmem>>, vector<1x8x64xf32>
    %400 = vector.shape_cast %399 : vector<1x8x64xf32> to vector<8x64xf32>
    %401 = vector.shape_cast %396 : vector<8x64xf32> to vector<1x8x64xf32>
    tpu.vector_store %arg7[%398, %c0_54, %c0_55], %401 {strides = array<i32>} : memref<8x8x64xf32, #tpu.memory_space<vmem>>, vector<1x8x64xf32>,
    %c6_i32 = arith.constant 6 : i32
    %402 = arith.index_cast %c6_i32 : i32 to index
    %c0_56 = arith.constant 0 : index
    %c0_57 = arith.constant 0 : index
    %403 = vector.load %arg2[%402, %c0_56, %c0_57] : memref<8x8x32xf32, #tpu.memory_space<vmem>>, vector<1x8x32xf32>
    %404 = vector.shape_cast %403 : vector<1x8x32xf32> to vector<8x32xf32>
    %405 = tpu.concatenate %404, %396 in 1 : vector<8x32xf32>, vector<8x64xf32> -> vector<8x96xf32>
    %406 = arith.truncf %405 : vector<8x96xf32> to vector<8x96xbf16>
    %cst_58 = arith.constant dense<0.000000e+00> : vector<8x256xf32>
    %407 = tpu.matmul %406, %3, %cst_58 {dimension_numbers = #tpu.dot_dimension_numbers<[1], [0], [0], [1], [0, 0, 1, 1], [], []>} : vector<8x96xbf16>, vector<96x256xbf16>, vector<8x256xf32> -> vector<8x256xf32>
    %408 = arith.addf %407, %6 : vector<8x256xf32>
    %409 = vector.extract_strided_slice %408 {offsets = [0, 0], sizes = [8, 128], strides = [1, 1]} : vector<8x256xf32> to vector<8x128xf32>
    %410 = vector.extract_strided_slice %408 {offsets = [0, 128], sizes = [8, 128], strides = [1, 1]} : vector<8x256xf32> to vector<8x128xf32>
    %411 = arith.mulf %409, %409 : vector<8x128xf32>
    %412 = arith.mulf %410, %410 : vector<8x128xf32>
    %413 = arith.addf %411, %412 : vector<8x128xf32>
    %cst_59 = arith.constant 1.000000e-16 : f32
    %414 = vector.broadcast %cst_59 : f32 to vector<8x128xf32>
    %415 = arith.maximumf %413, %414 : vector<8x128xf32>
    %416 = math.rsqrt %415 : vector<8x128xf32>
    %417 = arith.mulf %413, %416 : vector<8x128xf32>
    %418 = arith.negf %417 : vector<8x128xf32>
    %419 = math.exp %418 : vector<8x128xf32>
    %cst_60 = arith.constant 1.000000e+00 : f32
    %420 = vector.broadcast %cst_60 : f32 to vector<8x128xf32>
    %421 = arith.addf %420, %419 : vector<8x128xf32>
    %422 = arith.divf %420, %421 : vector<8x128xf32>
    %423 = math.tanh %417 : vector<8x128xf32>
    %424 = arith.select %9, %422, %423 : vector<8x128xi1>, vector<8x128xf32>
    %425 = arith.mulf %424, %416 : vector<8x128xf32>
    %426 = arith.mulf %425, %409 : vector<8x128xf32>
    %427 = arith.mulf %425, %410 : vector<8x128xf32>
    %428 = vector.extract_strided_slice %426 {offsets = [0, 0], sizes = [8, 32], strides = [1, 1]} : vector<8x128xf32> to vector<8x32xf32>
    %429 = vector.extract_strided_slice %426 {offsets = [0, 32], sizes = [8, 32], strides = [1, 1]} : vector<8x128xf32> to vector<8x32xf32>
    %430 = vector.extract_strided_slice %426 {offsets = [0, 64], sizes = [8, 32], strides = [1, 1]} : vector<8x128xf32> to vector<8x32xf32>
    %431 = vector.extract_strided_slice %426 {offsets = [0, 96], sizes = [8, 32], strides = [1, 1]} : vector<8x128xf32> to vector<8x32xf32>
    %432 = vector.extract_strided_slice %427 {offsets = [0, 0], sizes = [8, 32], strides = [1, 1]} : vector<8x128xf32> to vector<8x32xf32>
    %433 = vector.extract_strided_slice %427 {offsets = [0, 32], sizes = [8, 32], strides = [1, 1]} : vector<8x128xf32> to vector<8x32xf32>
    %434 = vector.extract_strided_slice %427 {offsets = [0, 64], sizes = [8, 32], strides = [1, 1]} : vector<8x128xf32> to vector<8x32xf32>
    %435 = vector.extract_strided_slice %427 {offsets = [0, 96], sizes = [8, 32], strides = [1, 1]} : vector<8x128xf32> to vector<8x32xf32>
    %436 = vector.extract_strided_slice %397 {offsets = [0, 0], sizes = [8, 32], strides = [1, 1]} : vector<8x64xf32> to vector<8x32xf32>
    %437 = vector.extract_strided_slice %397 {offsets = [0, 32], sizes = [8, 32], strides = [1, 1]} : vector<8x64xf32> to vector<8x32xf32>
    %438 = arith.mulf %436, %429 : vector<8x32xf32>
    %439 = arith.mulf %428, %431 : vector<8x32xf32>
    %440 = arith.addf %438, %439 : vector<8x32xf32>
    %441 = arith.mulf %437, %433 : vector<8x32xf32>
    %442 = arith.mulf %432, %435 : vector<8x32xf32>
    %443 = arith.addf %441, %442 : vector<8x32xf32>
    %444 = arith.mulf %440, %440 : vector<8x32xf32>
    %445 = arith.mulf %443, %443 : vector<8x32xf32>
    %446 = arith.addf %444, %445 : vector<8x32xf32>
    %cst_61 = arith.constant 1.000000e-16 : f32
    %447 = vector.broadcast %cst_61 : f32 to vector<8x32xf32>
    %448 = arith.maximumf %446, %447 : vector<8x32xf32>
    %449 = math.rsqrt %448 : vector<8x32xf32>
    %450 = arith.mulf %446, %449 : vector<8x32xf32>
    %451 = math.tanh %450 : vector<8x32xf32>
    %452 = arith.mulf %451, %449 : vector<8x32xf32>
    %453 = arith.mulf %452, %440 : vector<8x32xf32>
    %454 = arith.mulf %452, %443 : vector<8x32xf32>
    %455 = arith.mulf %430, %453 : vector<8x32xf32>
    %456 = arith.mulf %434, %454 : vector<8x32xf32>
    %457 = arith.subf %455, %456 : vector<8x32xf32>
    %458 = arith.mulf %430, %454 : vector<8x32xf32>
    %459 = arith.mulf %434, %453 : vector<8x32xf32>
    %460 = arith.addf %458, %459 : vector<8x32xf32>
    %461 = tpu.concatenate %457, %460 in 1 : vector<8x32xf32>, vector<8x32xf32> -> vector<8x64xf32>
    %462 = tpu.concatenate %440, %443 in 1 : vector<8x32xf32>, vector<8x32xf32> -> vector<8x64xf32>
    %463 = arith.index_cast %c6_i32 : i32 to index
    %c0_62 = arith.constant 0 : index
    %c0_63 = arith.constant 0 : index
    %464 = vector.load %arg7[%463, %c0_62, %c0_63] : memref<8x8x64xf32, #tpu.memory_space<vmem>>, vector<1x8x64xf32>
    %465 = vector.shape_cast %464 : vector<1x8x64xf32> to vector<8x64xf32>
    %466 = vector.shape_cast %461 : vector<8x64xf32> to vector<1x8x64xf32>
    tpu.vector_store %arg7[%463, %c0_62, %c0_63], %466 {strides = array<i32>} : memref<8x8x64xf32, #tpu.memory_space<vmem>>, vector<1x8x64xf32>,
    %c7_i32 = arith.constant 7 : i32
    %467 = arith.index_cast %c7_i32 : i32 to index
    %c0_64 = arith.constant 0 : index
    %c0_65 = arith.constant 0 : index
    %468 = vector.load %arg2[%467, %c0_64, %c0_65] : memref<8x8x32xf32, #tpu.memory_space<vmem>>, vector<1x8x32xf32>
    %469 = vector.shape_cast %468 : vector<1x8x32xf32> to vector<8x32xf32>
    %470 = tpu.concatenate %469, %461 in 1 : vector<8x32xf32>, vector<8x64xf32> -> vector<8x96xf32>
    %471 = arith.truncf %470 : vector<8x96xf32> to vector<8x96xbf16>
    %cst_66 = arith.constant dense<0.000000e+00> : vector<8x256xf32>
    %472 = tpu.matmul %471, %3, %cst_66 {dimension_numbers = #tpu.dot_dimension_numbers<[1], [0], [0], [1], [0, 0, 1, 1], [], []>} : vector<8x96xbf16>, vector<96x256xbf16>, vector<8x256xf32> -> vector<8x256xf32>
    %473 = arith.addf %472, %6 : vector<8x256xf32>
    %474 = vector.extract_strided_slice %473 {offsets = [0, 0], sizes = [8, 128], strides = [1, 1]} : vector<8x256xf32> to vector<8x128xf32>
    %475 = vector.extract_strided_slice %473 {offsets = [0, 128], sizes = [8, 128], strides = [1, 1]} : vector<8x256xf32> to vector<8x128xf32>
    %476 = arith.mulf %474, %474 : vector<8x128xf32>
    %477 = arith.mulf %475, %475 : vector<8x128xf32>
    %478 = arith.addf %476, %477 : vector<8x128xf32>
    %cst_67 = arith.constant 1.000000e-16 : f32
    %479 = vector.broadcast %cst_67 : f32 to vector<8x128xf32>
    %480 = arith.maximumf %478, %479 : vector<8x128xf32>
    %481 = math.rsqrt %480 : vector<8x128xf32>
    %482 = arith.mulf %478, %481 : vector<8x128xf32>
    %483 = arith.negf %482 : vector<8x128xf32>
    %484 = math.exp %483 : vector<8x128xf32>
    %cst_68 = arith.constant 1.000000e+00 : f32
    %485 = vector.broadcast %cst_68 : f32 to vector<8x128xf32>
    %486 = arith.addf %485, %484 : vector<8x128xf32>
    %487 = arith.divf %485, %486 : vector<8x128xf32>
    %488 = math.tanh %482 : vector<8x128xf32>
    %489 = arith.select %9, %487, %488 : vector<8x128xi1>, vector<8x128xf32>
    %490 = arith.mulf %489, %481 : vector<8x128xf32>
    %491 = arith.mulf %490, %474 : vector<8x128xf32>
    %492 = arith.mulf %490, %475 : vector<8x128xf32>
    %493 = vector.extract_strided_slice %491 {offsets = [0, 0], sizes = [8, 32], strides = [1, 1]} : vector<8x128xf32> to vector<8x32xf32>
    %494 = vector.extract_strided_slice %491 {offsets = [0, 32], sizes = [8, 32], strides = [1, 1]} : vector<8x128xf32> to vector<8x32xf32>
    %495 = vector.extract_strided_slice %491 {offsets = [0, 64], sizes = [8, 32], strides = [1, 1]} : vector<8x128xf32> to vector<8x32xf32>
    %496 = vector.extract_strided_slice %491 {offsets = [0, 96], sizes = [8, 32], strides = [1, 1]} : vector<8x128xf32> to vector<8x32xf32>
    %497 = vector.extract_strided_slice %492 {offsets = [0, 0], sizes = [8, 32], strides = [1, 1]} : vector<8x128xf32> to vector<8x32xf32>
    %498 = vector.extract_strided_slice %492 {offsets = [0, 32], sizes = [8, 32], strides = [1, 1]} : vector<8x128xf32> to vector<8x32xf32>
    %499 = vector.extract_strided_slice %492 {offsets = [0, 64], sizes = [8, 32], strides = [1, 1]} : vector<8x128xf32> to vector<8x32xf32>
    %500 = vector.extract_strided_slice %492 {offsets = [0, 96], sizes = [8, 32], strides = [1, 1]} : vector<8x128xf32> to vector<8x32xf32>
    %501 = vector.extract_strided_slice %462 {offsets = [0, 0], sizes = [8, 32], strides = [1, 1]} : vector<8x64xf32> to vector<8x32xf32>
    %502 = vector.extract_strided_slice %462 {offsets = [0, 32], sizes = [8, 32], strides = [1, 1]} : vector<8x64xf32> to vector<8x32xf32>
    %503 = arith.mulf %501, %494 : vector<8x32xf32>
    %504 = arith.mulf %493, %496 : vector<8x32xf32>
    %505 = arith.addf %503, %504 : vector<8x32xf32>
    %506 = arith.mulf %502, %498 : vector<8x32xf32>
    %507 = arith.mulf %497, %500 : vector<8x32xf32>
    %508 = arith.addf %506, %507 : vector<8x32xf32>
    %509 = arith.mulf %505, %505 : vector<8x32xf32>
    %510 = arith.mulf %508, %508 : vector<8x32xf32>
    %511 = arith.addf %509, %510 : vector<8x32xf32>
    %cst_69 = arith.constant 1.000000e-16 : f32
    %512 = vector.broadcast %cst_69 : f32 to vector<8x32xf32>
    %513 = arith.maximumf %511, %512 : vector<8x32xf32>
    %514 = math.rsqrt %513 : vector<8x32xf32>
    %515 = arith.mulf %511, %514 : vector<8x32xf32>
    %516 = math.tanh %515 : vector<8x32xf32>
    %517 = arith.mulf %516, %514 : vector<8x32xf32>
    %518 = arith.mulf %517, %505 : vector<8x32xf32>
    %519 = arith.mulf %517, %508 : vector<8x32xf32>
    %520 = arith.mulf %495, %518 : vector<8x32xf32>
    %521 = arith.mulf %499, %519 : vector<8x32xf32>
    %522 = arith.subf %520, %521 : vector<8x32xf32>
    %523 = arith.mulf %495, %519 : vector<8x32xf32>
    %524 = arith.mulf %499, %518 : vector<8x32xf32>
    %525 = arith.addf %523, %524 : vector<8x32xf32>
    %526 = tpu.concatenate %522, %525 in 1 : vector<8x32xf32>, vector<8x32xf32> -> vector<8x64xf32>
    %527 = tpu.concatenate %505, %508 in 1 : vector<8x32xf32>, vector<8x32xf32> -> vector<8x64xf32>
    %528 = arith.index_cast %c7_i32 : i32 to index
    %c0_70 = arith.constant 0 : index
    %c0_71 = arith.constant 0 : index
    %529 = vector.load %arg7[%528, %c0_70, %c0_71] : memref<8x8x64xf32, #tpu.memory_space<vmem>>, vector<1x8x64xf32>
    %530 = vector.shape_cast %529 : vector<1x8x64xf32> to vector<8x64xf32>
    %531 = vector.shape_cast %526 : vector<8x64xf32> to vector<1x8x64xf32>
    tpu.vector_store %arg7[%528, %c0_70, %c0_71], %531 {strides = array<i32>} : memref<8x8x64xf32, #tpu.memory_space<vmem>>, vector<1x8x64xf32>,
    %c8_i32 = arith.constant 8 : i32
    %c0_72 = arith.constant 0 : index
    %c0_73 = arith.constant 0 : index
    %532 = vector.load %arg9[%c0_72, %c0_73] : memref<8x64xf32, #tpu.memory_space<vmem>>, vector<8x64xf32>
    tpu.vector_store %arg9[%c0_72, %c0_73], %526 {strides = array<i32>} : memref<8x64xf32, #tpu.memory_space<vmem>>, vector<8x64xf32>,
    %c0_74 = arith.constant 0 : index
    %c0_75 = arith.constant 0 : index
    %533 = vector.load %arg10[%c0_74, %c0_75] : memref<8x64xf32, #tpu.memory_space<vmem>>, vector<8x64xf32>
    tpu.vector_store %arg10[%c0_74, %c0_75], %527 {strides = array<i32>} : memref<8x64xf32, #tpu.memory_space<vmem>>, vector<8x64xf32>,
    %c0_i32_76 = arith.constant 0 : i32
    %534 = arith.cmpi eq, %arg1, %c0_i32_76 : i32
    %535 = arith.extui %534 : i1 to i32
    %c0_i32_77 = arith.constant 0 : i32
    %536 = arith.cmpi ne, %535, %c0_i32_77 : i32
    scf.if %536 {
      %537 = tpu.concatenate %526, %527 in 1 : vector<8x64xf32>, vector<8x64xf32> -> vector<8x128xf32>
      %c0_78 = arith.constant 0 : index
      %c0_79 = arith.constant 0 : index
      %538 = vector.load %arg8[%c0_78, %c0_79] : memref<8x128xf32, #tpu.memory_space<vmem>>, vector<8x128xf32>
      tpu.vector_store %arg8[%c0_78, %c0_79], %537 {strides = array<i32>} : memref<8x128xf32, #tpu.memory_space<vmem>>, vector<8x128xf32>,
    } else {
    }
    return
  }
  func.func @transform_0(%arg0: i32, %arg1: i32) -> (i32, i32, i32) {
    %c0_i32 = arith.constant 0 : i32
    %c0_i32_0 = arith.constant 0 : i32
    return %arg1, %arg0, %c0_i32 : i32, i32, i32
  }
  func.func @transform_1(%arg0: i32, %arg1: i32) -> (i32, i32) {
    %c0_i32 = arith.constant 0 : i32
    %c0_i32_0 = arith.constant 0 : i32
    %c0_i32_1 = arith.constant 0 : i32
    return %c0_i32, %c0_i32_0 : i32, i32
  }
  func.func @transform_2(%arg0: i32, %arg1: i32) -> (i32, i32) {
    %c0_i32 = arith.constant 0 : i32
    %c0_i32_0 = arith.constant 0 : i32
    %c0_i32_1 = arith.constant 0 : i32
    return %c0_i32, %c0_i32_0 : i32, i32
  }
  func.func @transform_3(%arg0: i32, %arg1: i32) -> (i32, i32) {
    %c0_i32 = arith.constant 0 : i32
    %c0_i32_0 = arith.constant 0 : i32
    return %arg0, %c0_i32 : i32, i32
  }
  func.func @transform_4(%arg0: i32, %arg1: i32) -> (i32, i32) {
    %c0_i32 = arith.constant 0 : i32
    %c0_i32_0 = arith.constant 0 : i32
    return %arg0, %c0_i32 : i32, i32
  }
  func.func @transform_5(%arg0: i32, %arg1: i32) -> (i32, i32, i32) {
    %c0_i32 = arith.constant 0 : i32
    %c0_i32_0 = arith.constant 0 : i32
    return %arg1, %arg0, %c0_i32 : i32, i32, i32
  }
  func.func @transform_6(%arg0: i32, %arg1: i32) -> (i32, i32) {
    %c0_i32 = arith.constant 0 : i32
    %c0_i32_0 = arith.constant 0 : i32
    return %arg0, %c0_i32 : i32, i32
  }
}

</mosaic_0001>

<bundles_post_ra>
// kernel: complex_lstm_forward.1
= control target key start
LH: loop header
LB: loop body
LE: loop exit
PB: predicated region body
PF: predicated region fallthrough
CT: control target
= control target key end

     0   :  { %vm28_vm0 = vcmask 523264   ;;  %s1532_s26 = smov 32   ;;  %vm60_vm1 = vcmask 261120   ;;  %vm123_vm2 = vcmask 785408   ;;  %s1534_s27 = smov 64   ;;  %s2087_s3 = inlined_call_operand.vmem [shape: f32[8,64], index: 3, kind: input, shape index: {}, may-alias: {3,4}]   ;;  %s2088_s1 = inlined_call_operand.vmem [shape: bf16[96,256], index: 1, kind: input, shape index: {}]   ;;  %s2089_s0 = inlined_call_operand.vmem [shape: f32[8,8,32], index: 0, kind: input, shape index: {}]   ;;  %s2090_s2 = inlined_call_operand.vmem [shape: f32[1,256], index: 2, kind: input, shape index: {}]   ;;  %s2091_s4 = inlined_call_operand.vmem [shape: f32[8,64], index: 4, kind: input, shape index: {}, may-alias: {3,4}]   ;;  %s2092_s5 = inlined_call_operand.vmem [shape: f32[8,8,64], index: 5, kind: output, shape index: {0}]   ;;  %s2093_s6 = inlined_call_operand.vmem [shape: f32[8,128], index: 6, kind: output, shape index: {1}]  }
   0x1   :  { %v27_v0 = vld [vmem:[%s2087_s3] sm:$0xff]  ;;  %v1377_v1 = vld [vmem:[%s2088_s1 + $0x50] sm:$0xf]  ;;  %v1432_v2 = vld [vmem:[%s2088_s1 + $0x54] sm:$0xf0] }
   0x2   :  { %29 = vst.msk [vmem:[#allocation2] sm:$0xff] %vm28_vm0, %v27_v0  ;;  %v1580_v3 = vor.u32 %v1432_v2, %v1377_v1  ;;  %v1431_v4 = vld [vmem:[%s2088_s1 + $0x54] sm:$0xf]  ;;  %v1379_v5 = vld [vmem:[%s2088_s1 + $0x58] sm:$0xf0]  ;;  %v55_v38 = vld [vmem:[%s2089_s0] sm:$0xff] }
   0x3   :  { %v1588_v6 = vor.u32 %v1431_v4, %v1379_v5  ;;  %v1369_v7 = vld [vmem:[%s2088_s1 + $0x40] sm:$0xf]  ;;  %v1430_v8 = vld [vmem:[%s2088_s1 + $0x44] sm:$0xf0]  ;;  %v1429_v9 = vld [vmem:[%s2088_s1 + $0x44] sm:$0xf]  ;;  %v50_v5 = vlaneseq }
   0x4   :  { %129 = vmatpush.bf16.msra.mxu0 %v1580_v3  ;;  %v1600_v10 = vor.u32 %v1430_v8, %v1369_v7  ;;  %v1371_v11 = vld [vmem:[%s2088_s1 + $0x48] sm:$0xf0]  ;;  %279 = vmatpush.bf16.msra.mxu2 %v1580_v3  ;;  %v1361_v13 = vld [vmem:[%s2088_s1 + $0x30] sm:$0xf]  ;;  %v1428_v14 = vld [vmem:[%s2088_s1 + $0x34] sm:$0xf0] }
   0x5   :  { %142 = vmatpush.bf16.msra.mxu1 %v1588_v6  ;;  %v1607_v12 = vor.u32 %v1429_v9, %v1371_v11  ;;  %292 = vmatpush.bf16.msra.mxu3 %v1588_v6  ;;  %v1427_v15 = vld [vmem:[%s2088_s1 + $0x34] sm:$0xf]  ;;  %v1363_v16 = vld [vmem:[%s2088_s1 + $0x38] sm:$0xf0]  ;;  %v1623_v17 = vor.u32 %v1428_v14, %v1361_v13  ;;  %v1353_v20 = vld [vmem:[%s2088_s1 + $0x20] sm:$0xf] }
   0x6   :  { %v1627_v19 = vor.u32 %v1427_v15, %v1363_v16  ;;  %v1426_v21 = vld [vmem:[%s2088_s1 + $0x24] sm:$0xf0]  ;;  %v1425_v22 = vld [vmem:[%s2088_s1 + $0x24] sm:$0xf]  ;;  %v1355_v23 = vld [vmem:[%s2088_s1 + $0x28] sm:$0xf0] }
   0x7   :  { %v1644_v24 = vor.u32 %v1426_v21, %v1353_v20  ;;  %v1648_v25 = vor.u32 %v1425_v22, %v1355_v23  ;;  %v1345_v26 = vld [vmem:[%s2088_s1 + $0x10] sm:$0xf]  ;;  %v1424_v27 = vld [vmem:[%s2088_s1 + $0x14] sm:$0xf0]  ;;  %v1423_v28 = vld [vmem:[%s2088_s1 + $0x14] sm:$0xf] }
   0x8   :  { %130 = vmatpush.bf16.msra.mxu0 %v1600_v10  ;;  %280 = vmatpush.bf16.msra.mxu2 %v1600_v10  ;;  %v1347_v29 = vld [vmem:[%s2088_s1 + $0x18] sm:$0xf0]  ;;  %v1664_v30 = vor.u32 %v1424_v27, %v1345_v26  ;;  %v1337_v32 = vld [vmem:[%s2088_s1] sm:$0xf]  ;;  %v1422_v33 = vld [vmem:[%s2088_s1 + $0x4] sm:$0xf0] }
   0x9   :  { %v53_v18 = vld [vmem:[#allocation2] sm:$0xff]  ;;  %143 = vmatpush.bf16.msra.mxu1 %v1607_v12  ;;  %293 = vmatpush.bf16.msra.mxu3 %v1607_v12  ;;  %v1668_v31 = vor.u32 %v1423_v28, %v1347_v29  ;;  %v1684_v35 = vor.u32 %v1422_v33, %v1337_v32  ;;  %v1339_v36 = vld [vmem:[%s2088_s1 + $0x8] sm:$0xf0]  ;;  %v1750_v9 = vand.u32 127, %v50_v5 }
   0xa   :  { %57 = vrot.lane.b32.xlu0 %v53_v18, %s1532_s26  ;;  %v1421_v34 = vld [vmem:[%s2088_s1 + $0x4] sm:$0xf]  ;;  %v44_v42 = vld [vmem:[%s2090_s2] sm:$0x3] }
   0xb   :  { %v1689_v37 = vor.u32 %v1421_v34, %v1339_v36  ;;  %v1740_v43 = vperm.slane %v44_v42, 0  ;;  %v1742_v44 = vperm.slane %v44_v42, 1  ;;  %v30_v59 = vld [vmem:[%s2091_s4] sm:$0xff]  ;;  %vm52_vm8 = vcmp.lt.s32.totalorder %v1750_v9, 96  ;;  %s1533_s4 = smov 96  }
   0xc   :  { %131 = vmatpush.bf16.msra.mxu0 %v1623_v17  ;;  %281 = vmatpush.bf16.msra.mxu2 %v1623_v17  ;;  %31 = vst.msk [vmem:[#allocation3] sm:$0xff] %vm28_vm0, %v30_v59 }
   0xd   :  { %144 = vmatpush.bf16.msra.mxu1 %v1627_v19  ;;  %294 = vmatpush.bf16.msra.mxu3 %v1627_v19 }
  0x10   :  { %132 = vmatpush.bf16.msra.mxu0 %v1644_v24  ;;  %282 = vmatpush.bf16.msra.mxu2 %v1644_v24 }
  0x11   :  { %145 = vmatpush.bf16.msra.mxu1 %v1648_v25  ;;  %295 = vmatpush.bf16.msra.mxu3 %v1648_v25 }
  0x13   :  { %v54_v32 = vld [vmem:[#allocation3] sm:$0xff] }
  0x14   :  { %133 = vmatpush.bf16.msra.mxu0 %v1664_v30  ;;  %283 = vmatpush.bf16.msra.mxu2 %v1664_v30 }
  0x15   :  { %146 = vmatpush.bf16.msra.mxu1 %v1668_v31  ;;  %296 = vmatpush.bf16.msra.mxu3 %v1668_v31 }
  0x18   :  { %134 = vmatpush.bf16.msra.mxu0 %v1684_v35  ;;  %284 = vmatpush.bf16.msra.mxu2 %v1684_v35 }
  0x19   :  { %147 = vmatpush.bf16.msra.mxu1 %v1689_v37  ;;  %297 = vmatpush.bf16.msra.mxu3 %v1689_v37 }
  0x1c   :  { %429 = vmatpush.bf16.msrb.mxu0 %v1580_v3  ;;  %579 = vmatpush.bf16.msrb.mxu2 %v1580_v3 }
  0x1d   :  { %442 = vmatpush.bf16.msrb.mxu1 %v1588_v6  ;;  %592 = vmatpush.bf16.msrb.mxu3 %v1588_v6 }
  0x20   :  { %430 = vmatpush.bf16.msrb.mxu0 %v1600_v10  ;;  %580 = vmatpush.bf16.msrb.mxu2 %v1600_v10 }
  0x21   :  { %443 = vmatpush.bf16.msrb.mxu1 %v1607_v12  ;;  %593 = vmatpush.bf16.msrb.mxu3 %v1607_v12 }
  0x24   :  { %431 = vmatpush.bf16.msrb.mxu0 %v1623_v17  ;;  %581 = vmatpush.bf16.msrb.mxu2 %v1623_v17 }
  0x25   :  { %444 = vmatpush.bf16.msrb.mxu1 %v1627_v19  ;;  %594 = vmatpush.bf16.msrb.mxu3 %v1627_v19 }
  0x28   :  { %432 = vmatpush.bf16.msrb.mxu0 %v1644_v24  ;;  %582 = vmatpush.bf16.msrb.mxu2 %v1644_v24 }
  0x29   :  { %445 = vmatpush.bf16.msrb.mxu1 %v1648_v25  ;;  %595 = vmatpush.bf16.msrb.mxu3 %v1648_v25 }
  0x2c   :  { %433 = vmatpush.bf16.msrb.mxu0 %v1664_v30  ;;  %583 = vmatpush.bf16.msrb.mxu2 %v1664_v30 }
  0x2d   :  { %446 = vmatpush.bf16.msrb.mxu1 %v1668_v31  ;;  %596 = vmatpush.bf16.msrb.mxu3 %v1668_v31 }
  0x30   :  { %434 = vmatpush.bf16.msrb.mxu0 %v1684_v35  ;;  %584 = vmatpush.bf16.msrb.mxu2 %v1684_v35 }
  0x31   :  { %447 = vmatpush.bf16.msrb.mxu1 %v1689_v37  ;;  %597 = vmatpush.bf16.msrb.mxu3 %v1689_v37 }
  0x7c   :  { %v58_v39 = vpop.permute.xlu0 %57 }
  0x7d   :  { %v61_v40 = vsel %vm60_vm1, %v55_v38, %v58_v39 }
  0x7e   :  { %v62_v41 = vpack.c.bf16 %v61_v40, %v61_v40 }
  0x80   :  { %1383 = vmatmul.msk.bf16.vlgmr.msra.gmra.mxu0 %vm123_vm2, %v62_v41  ;;  %1384 = vmatmul.msk.bf16.vlgmr.msra.gmra.mxu1 %vm123_vm2, %v62_v41 }
  0x81   :  { %729 = vmatpush.bf16.msra.mxu0 %v1580_v3  ;;  %742 = vmatpush.bf16.msra.mxu1 %v1588_v6 }
  0x85   :  { %730 = vmatpush.bf16.msra.mxu0 %v1600_v10  ;;  %743 = vmatpush.bf16.msra.mxu1 %v1607_v12 }
  0x89   :  { %731 = vmatpush.bf16.msra.mxu0 %v1623_v17  ;;  %744 = vmatpush.bf16.msra.mxu1 %v1627_v19 }
  0x8d   :  { %732 = vmatpush.bf16.msra.mxu0 %v1644_v24  ;;  %745 = vmatpush.bf16.msra.mxu1 %v1648_v25 }
  0x91   :  { %733 = vmatpush.bf16.msra.mxu0 %v1664_v30  ;;  %746 = vmatpush.bf16.msra.mxu1 %v1668_v31 }
  0x95   :  { %734 = vmatpush.bf16.msra.mxu0 %v1684_v35  ;;  %747 = vmatpush.bf16.msra.mxu1 %v1689_v37 }
  0xfd   :  { %v136_v45 = vpop.f32.mrf.mxu0  ;;  %v149_v46 = vpop.f32.mrf.mxu1 }
  0xfe   :  { %v137_v47 = vadd.f32 %v136_v45, %v1740_v43  ;;  %v150_v48 = vadd.f32 %v149_v46, %v1742_v44 }
 0x100   :  { %v153_v49 = vmul.f32 %v137_v47, %v137_v47  ;;  %v154_v50 = vmul.f32 %v150_v48, %v150_v48 }
 0x102   :  { %v155_v51 = vadd.f32 %v154_v50, %v153_v49 }
 0x104   :  { %v156_v52 = vmax.f32 %v155_v51, 1e-16 }
 0x105   :  { %v138_v53 = vpop.f32.mrf.mxu0  ;;  %v151_v54 = vpop.f32.mrf.mxu1 }
 0x106   :  { %1436 = vrsqrt.f32 %v156_v52  ;;  %vm163_vm4 = vweird.f32 %v156_v52 }
 0x10c   :  { %v1437_v55 = vpop.eup %1436 }
 0x10d   :  { %v158_v56 = vmul.f32 %v1437_v55, %v156_v52  ;;  %vm164_vm3 = vweird.f32 %v1437_v55 }
 0x10e   :  { %vm165_vm5 = vmor %vm163_vm4, %vm164_vm3 }
 0x10f   :  { %v159_v57 = vmul.f32 %v1437_v55, %v158_v56 }
 0x111   :  { %v160_v58 = vmul.f32 0.5, %v159_v57 }
 0x113   :  { %v161_v60 = vsub.f32 1.5, %v160_v58 }
 0x115   :  { %v162_v61 = vmul.f32 %v1437_v55, %v161_v60 }
 0x117   :  { %v166_v62 = vsel %vm165_vm5, %v1437_v55, %v162_v61 }
 0x118   :  { %v167_v63 = vmul.f32 %v166_v62, %v155_v51 }
 0x11a   :  { %v1385_v0 = vmul.f32 -1.442695, %v167_v63 }
 0x11c   :  { %1438 = vpow2.f32 %v1385_v0 }
 0x122   :  { %v1439_v1 = vpop.eup %1438 }
 0x123   :  { %v171_v2 = vadd.f32 1.0, %v1439_v1 }
 0x125   :  { %1440 = vrcp.f32 %v171_v2  ;;  %v183_v11 = vand.u32 2147483648, %v171_v2  ;;  %v181_v14 = vand.u32 2147483647, %v171_v2  ;;  %vm177_vm7 = vweird.f32 %v171_v2 }
 0x126   :  { %1442 = vtanh.f32 %v167_v63 }
 0x127   :  { %v184_v16 = vor.u32 1.1754944e-38, %v183_v11  ;;  %vm182_vm10 = vcmp.eq.f32.partialorder %v181_v14, 8.507059e+37 }
 0x12b   :  { %v1441_v4 = vpop.eup %1440 }
 0x12c   :  { %v173_v7 = vmul.f32 %v1441_v4, %v171_v2  ;;  %vm178_vm6 = vweird.f32 %v1441_v4  ;;  %v1443_v20 = vpop.eup %1442 }
 0x12d   :  { %vm179_vm9 = vmor %vm177_vm7, %vm178_vm6 }
 0x12e   :  { %v174_v8 = vsub.f32 1.0, %v173_v7 }
 0x130   :  { %v175_v13 = vmul.f32 %v1441_v4, %v174_v8 }
 0x132   :  { %v176_v15 = vadd.f32 %v1441_v4, %v175_v13 }
 0x134   :  { %v180_v18 = vsel %vm179_vm9, %v1441_v4, %v176_v15  ;;  %v1386_v15 = vld [vmem:[%s2089_s0 + $0x8] sm:$0xff] }
 0x135   :  { %v185_v21 = vsel %vm182_vm10, %v184_v16, %v180_v18 }
 0x136   :  { %v188_v22 = vsel %vm52_vm8, %v185_v21, %v1443_v20 }
 0x137   :  { %v189_v23 = vmul.f32 %v188_v22, %v166_v62 }
 0x139   :  { %v190_v26 = vmul.f32 %v189_v23, %v137_v47  ;;  %v191_v27 = vmul.f32 %v189_v23, %v150_v48 }
 0x13b   :  { %204 = vrot.lane.b32.xlu0 %v191_v27, %s1532_s26  ;;  %197 = vrot.lane.b32.xlu2 %v190_v26, %s1532_s26  ;;  %v202_v33 = vmul.f32 %v191_v27, %v54_v32 }
 0x195   :  { %v198_v40 = vpop.permute.xlu2 %197 }
 0x196   :  { %v200_v42 = vmul.f32 %v198_v40, %v190_v26 }
 0x1ad   :  { %v205_v28 = vpop.permute.xlu0 %204 }
 0x1ae   :  { %v207_v29 = vmul.f32 %v205_v28, %v191_v27 }
 0x1b0   :  { %209 = vrot.lane.b32.xlu1 %v207_v29, %s1532_s26 }
 0x1b8   :  { %193 = vrot.lane.b32.xlu1 %v190_v26, %s1533_s4 }
 0x222   :  { %v210_v34 = vpop.permute.xlu1 %209 }
 0x223   :  { %v1759_v36 = vadd.f32 %v210_v34, %v202_v33 }
 0x225   :  { %236 = vrot.lane.b32.xlu0 %v1759_v36, %s1533_s4  ;;  %v214_v38 = vmul.f32 %v1759_v36, %v1759_v36 }
 0x227   :  { %216 = vrot.lane.b32.xlu2 %v214_v38, %s1533_s4 }
 0x22a   :  { %v194_v39 = vpop.permute.xlu1 %193 }
 0x22b   :  { %v196_v41 = vmul.f32 %v194_v39, %v54_v32 }
 0x22d   :  { %v1766_v45 = vadd.f32 %v200_v42, %v196_v41 }
 0x22f   :  { %v213_v46 = vmul.f32 %v1766_v45, %v1766_v45 }
 0x281   :  { %v217_v47 = vpop.permute.xlu2 %216 }
 0x282   :  { %v219_v48 = vadd.f32 %v217_v47, %v213_v46 }
 0x284   :  { %v220_v49 = vmax.f32 %v219_v48, 1e-16 }
 0x286   :  { %1444 = vrsqrt.f32 %v220_v49  ;;  %vm227_vm12 = vweird.f32 %v220_v49 }
 0x28c   :  { %v1445_v50 = vpop.eup %1444 }
 0x28d   :  { %v222_v51 = vmul.f32 %v1445_v50, %v220_v49  ;;  %vm228_vm11 = vweird.f32 %v1445_v50 }
 0x28e   :  { %vm229_vm13 = vmor %vm227_vm12, %vm228_vm11 }
 0x28f   :  { %v223_v52 = vmul.f32 %v1445_v50, %v222_v51 }
 0x291   :  { %v224_v53 = vmul.f32 0.5, %v223_v52 }
 0x293   :  { %v225_v54 = vsub.f32 1.5, %v224_v53 }
 0x295   :  { %v226_v55 = vmul.f32 %v1445_v50, %v225_v54 }
 0x297   :  { %v230_v56 = vsel %vm229_vm13, %v1445_v50, %v226_v55  ;;  %v237_v60 = vpop.permute.xlu0 %236 }
 0x298   :  { %v231_v57 = vmul.f32 %v230_v56, %v219_v48 }
 0x29a   :  { %1446 = vtanh.f32 %v231_v57 }
 0x2a0   :  { %v1447_v58 = vpop.eup %1446 }
 0x2a1   :  { %v233_v59 = vmul.f32 %v1447_v58, %v230_v56 }
 0x2a3   :  { %v239_v61 = vmul.f32 %v237_v60, %v233_v59  ;;  %v234_v62 = vmul.f32 %v233_v59, %v1766_v45 }
 0x2a5   :  { %246 = vrot.lane.b32.xlu2 %v239_v61, %s1534_s27  ;;  %241 = vrot.lane.b32.xlu1 %v234_v62, %s1534_s27 }
 0x2ff   :  { %v247_v63 = vpop.permute.xlu2 %246 }
 0x300   :  { %v249_v1 = vmul.f32 %v247_v63, %v191_v27  ;;  %v251_v2 = vmul.f32 %v247_v63, %v190_v26 }
 0x317   :  { %v242_v0 = vpop.permute.xlu1 %241 }
 0x318   :  { %v244_v4 = vmul.f32 %v242_v0, %v190_v26  ;;  %v252_v5 = vmul.f32 %v242_v0, %v191_v27 }
 0x31a   :  { %v250_v7 = vsub.f32 %v244_v4, %v249_v1  ;;  %v253_v8 = vadd.f32 %v252_v5, %v251_v2 }
 0x31c   :  { %259 = vrot.lane.b32.xlu1 %v253_v8, %s1533_s4  ;;  %255 = vrot.lane.b32.xlu0 %v250_v7, %s1534_s27  ;;  %v263_v7 = vsel %vm60_vm1, %v1766_v45, %v1759_v36 }
 0x38e   :  { %v260_v11 = vpop.permute.xlu1 %259  ;;  %v256_v13 = vpop.permute.xlu0 %255 }
 0x38f   :  { %v262_v14 = vsel %vm60_vm1, %v256_v13, %v260_v11 }
 0x390   :  { %269 = vrot.lane.b32.xlu2 %v262_v14, %s1532_s26  ;;  %265 = vst.msk [vmem:[%s2092_s5] sm:$0xff] %vm28_vm0, %v262_v14 }
 0x3ea   :  { %v270_v16 = vpop.permute.xlu2 %269 }
 0x3eb   :  { %v272_v18 = vsel %vm60_vm1, %v1386_v15, %v270_v16 }
 0x3ec   :  { %v273_v20 = vpack.c.bf16 %v272_v18, %v272_v18 }
 0x3ee   :  { %1387 = vmatmul.msk.bf16.vlgmr.msra.gmra.mxu2 %vm123_vm2, %v273_v20  ;;  %1388 = vmatmul.msk.bf16.vlgmr.msra.gmra.mxu3 %vm123_vm2, %v273_v20 }
 0x3ef   :  { %879 = vmatpush.bf16.msra.mxu2 %v1580_v3  ;;  %892 = vmatpush.bf16.msra.mxu3 %v1588_v6 }
 0x3f3   :  { %880 = vmatpush.bf16.msra.mxu2 %v1600_v10  ;;  %893 = vmatpush.bf16.msra.mxu3 %v1607_v12 }
 0x3f7   :  { %881 = vmatpush.bf16.msra.mxu2 %v1623_v17  ;;  %894 = vmatpush.bf16.msra.mxu3 %v1627_v19 }
 0x3fb   :  { %882 = vmatpush.bf16.msra.mxu2 %v1644_v24  ;;  %895 = vmatpush.bf16.msra.mxu3 %v1648_v25 }
 0x3ff   :  { %883 = vmatpush.bf16.msra.mxu2 %v1664_v30  ;;  %896 = vmatpush.bf16.msra.mxu3 %v1668_v31 }
 0x403   :  { %884 = vmatpush.bf16.msra.mxu2 %v1684_v35  ;;  %897 = vmatpush.bf16.msra.mxu3 %v1689_v37 }
 0x471   :  { %v286_v21 = vpop.f32.mrf.mxu2  ;;  %v299_v22 = vpop.f32.mrf.mxu3 }
 0x472   :  { %v287_v23 = vadd.f32 %v286_v21, %v1740_v43  ;;  %v300_v26 = vadd.f32 %v299_v22, %v1742_v44 }
 0x474   :  { %v303_v27 = vmul.f32 %v287_v23, %v287_v23  ;;  %v304_v28 = vmul.f32 %v300_v26, %v300_v26 }
 0x476   :  { %v305_v29 = vadd.f32 %v304_v28, %v303_v27 }
 0x478   :  { %v306_v32 = vmax.f32 %v305_v29, 1e-16 }
 0x479   :  { %v288_v33 = vpop.f32.mrf.mxu2  ;;  %v301_v34 = vpop.f32.mrf.mxu3 }
 0x47a   :  { %1448 = vrsqrt.f32 %v306_v32  ;;  %vm313_vm15 = vweird.f32 %v306_v32 }
 0x480   :  { %v1449_v38 = vpop.eup %1448 }
 0x481   :  { %v308_v39 = vmul.f32 %v1449_v38, %v306_v32  ;;  %vm314_vm14 = vweird.f32 %v1449_v38 }
 0x482   :  { %vm315_vm3 = vmor %vm313_vm15, %vm314_vm14 }
 0x483   :  { %v309_v40 = vmul.f32 %v1449_v38, %v308_v39 }
 0x485   :  { %v310_v41 = vmul.f32 0.5, %v309_v40 }
 0x487   :  { %v311_v42 = vsub.f32 1.5, %v310_v41 }
 0x489   :  { %v312_v46 = vmul.f32 %v1449_v38, %v311_v42 }
 0x48b   :  { %v316_v47 = vsel %vm315_vm3, %v1449_v38, %v312_v46 }
 0x48c   :  { %v317_v48 = vmul.f32 %v316_v47, %v305_v29 }
 0x48e   :  { %v1389_v49 = vmul.f32 -1.442695, %v317_v48 }
 0x490   :  { %1450 = vpow2.f32 %v1389_v49 }
 0x496   :  { %v1451_v50 = vpop.eup %1450 }
 0x497   :  { %v321_v51 = vadd.f32 1.0, %v1451_v50 }
 0x499   :  { %1452 = vrcp.f32 %v321_v51  ;;  %v333_v55 = vand.u32 2147483648, %v321_v51  ;;  %v331_v57 = vand.u32 2147483647, %v321_v51  ;;  %vm327_vm5 = vweird.f32 %v321_v51 }
 0x49a   :  { %1454 = vtanh.f32 %v317_v48 }
 0x49b   :  { %v334_v59 = vor.u32 1.1754944e-38, %v333_v55  ;;  %vm332_vm7 = vcmp.eq.f32.partialorder %v331_v57, 8.507059e+37 }
 0x49f   :  { %v1453_v52 = vpop.eup %1452 }
 0x4a0   :  { %v323_v53 = vmul.f32 %v1453_v52, %v321_v51  ;;  %vm328_vm4 = vweird.f32 %v1453_v52  ;;  %v1455_v61 = vpop.eup %1454 }
 0x4a1   :  { %vm329_vm6 = vmor %vm327_vm5, %vm328_vm4 }
 0x4a2   :  { %v324_v54 = vsub.f32 1.0, %v323_v53 }
 0x4a4   :  { %v325_v56 = vmul.f32 %v1453_v52, %v324_v54 }
 0x4a6   :  { %v326_v58 = vadd.f32 %v1453_v52, %v325_v56 }
 0x4a8   :  { %v330_v60 = vsel %vm329_vm6, %v1453_v52, %v326_v58  ;;  %v1391_v58 = vld [vmem:[%s2089_s0 + $0x10] sm:$0xff] }
 0x4a9   :  { %v335_v62 = vsel %vm332_vm7, %v334_v59, %v330_v60 }
 0x4aa   :  { %v338_v63 = vsel %vm52_vm8, %v335_v62, %v1455_v61 }
 0x4ab   :  { %v339_v0 = vmul.f32 %v338_v63, %v316_v47 }
 0x4ad   :  { %v340_v1 = vmul.f32 %v339_v0, %v287_v23  ;;  %v341_v2 = vmul.f32 %v339_v0, %v300_v26 }
 0x4af   :  { %354 = vrot.lane.b32.xlu0 %v341_v2, %s1532_s26  ;;  %343 = vrot.lane.b32.xlu2 %v340_v1, %s1533_s4  ;;  %v352_v8 = vmul.f32 %v341_v2, %v263_v7 }
 0x4b7   :  { %347 = vrot.lane.b32.xlu0 %v340_v1, %s1532_s26 }
 0x509   :  { %v344_v16 = vpop.permute.xlu2 %343 }
 0x50a   :  { %v346_v20 = vmul.f32 %v344_v16, %v263_v7 }
 0x521   :  { %v355_v4 = vpop.permute.xlu0 %354 }
 0x522   :  { %v357_v5 = vmul.f32 %v355_v4, %v341_v2 }
 0x524   :  { %359 = vrot.lane.b32.xlu1 %v357_v5, %s1532_s26 }
 0x529   :  { %v348_v15 = vpop.permute.xlu0 %347 }
 0x52a   :  { %v350_v18 = vmul.f32 %v348_v15, %v340_v1 }
 0x52c   :  { %v1817_v21 = vadd.f32 %v350_v18, %v346_v20 }
 0x52e   :  { %v363_v36 = vmul.f32 %v1817_v21, %v1817_v21 }
 0x596   :  { %v360_v11 = vpop.permute.xlu1 %359 }
 0x597   :  { %v1810_v13 = vadd.f32 %v360_v11, %v352_v8 }
 0x599   :  { %386 = vrot.lane.b32.xlu2 %v1810_v13, %s1533_s4  ;;  %v364_v14 = vmul.f32 %v1810_v13, %v1810_v13 }
 0x59b   :  { %366 = vrot.lane.b32.xlu1 %v364_v14, %s1533_s4 }
 0x5f3   :  { %v387_v41 = vpop.permute.xlu2 %386 }
 0x60d   :  { %v367_v45 = vpop.permute.xlu1 %366 }
 0x60e   :  { %v369_v22 = vadd.f32 %v367_v45, %v363_v36 }
 0x610   :  { %v370_v23 = vmax.f32 %v369_v22, 1e-16 }
 0x612   :  { %1456 = vrsqrt.f32 %v370_v23  ;;  %vm377_vm10 = vweird.f32 %v370_v23 }
 0x618   :  { %v1457_v26 = vpop.eup %1456 }
 0x619   :  { %v372_v27 = vmul.f32 %v1457_v26, %v370_v23  ;;  %vm378_vm9 = vweird.f32 %v1457_v26 }
 0x61a   :  { %vm379_vm11 = vmor %vm377_vm10, %vm378_vm9 }
 0x61b   :  { %v373_v28 = vmul.f32 %v1457_v26, %v372_v27 }
 0x61d   :  { %v374_v29 = vmul.f32 0.5, %v373_v28 }
 0x61f   :  { %v375_v32 = vsub.f32 1.5, %v374_v29 }
 0x621   :  { %v376_v33 = vmul.f32 %v1457_v26, %v375_v32 }
 0x623   :  { %v380_v34 = vsel %vm379_vm11, %v1457_v26, %v376_v33 }
 0x624   :  { %v381_v38 = vmul.f32 %v380_v34, %v369_v22 }
 0x626   :  { %1458 = vtanh.f32 %v381_v38 }
 0x62c   :  { %v1459_v39 = vpop.eup %1458 }
 0x62d   :  { %v383_v40 = vmul.f32 %v1459_v39, %v380_v34 }
 0x62f   :  { %v384_v42 = vmul.f32 %v383_v40, %v1817_v21  ;;  %v389_v46 = vmul.f32 %v387_v41, %v383_v40 }
 0x631   :  { %391 = vrot.lane.b32.xlu0 %v384_v42, %s1534_s27  ;;  %396 = vrot.lane.b32.xlu1 %v389_v46, %s1534_s27 }
 0x6a3   :  { %v392_v47 = vpop.permute.xlu0 %391  ;;  %v397_v48 = vpop.permute.xlu1 %396 }
 0x6a4   :  { %v394_v49 = vmul.f32 %v392_v47, %v340_v1  ;;  %v402_v50 = vmul.f32 %v392_v47, %v341_v2  ;;  %v399_v51 = vmul.f32 %v397_v48, %v341_v2  ;;  %v401_v52 = vmul.f32 %v397_v48, %v340_v1 }
 0x6a6   :  { %v400_v53 = vsub.f32 %v394_v49, %v399_v51  ;;  %v403_v54 = vadd.f32 %v402_v50, %v401_v52 }
 0x6a8   :  { %409 = vrot.lane.b32.xlu0 %v403_v54, %s1533_s4  ;;  %405 = vrot.lane.b32.xlu2 %v400_v53, %s1534_s27  ;;  %v413_v53 = vsel %vm60_vm1, %v1817_v21, %v1810_v13 }
 0x702   :  { %v406_v55 = vpop.permute.xlu2 %405 }
 0x71a   :  { %v410_v56 = vpop.permute.xlu0 %409 }
 0x71b   :  { %v412_v57 = vsel %vm60_vm1, %v406_v55, %v410_v56 }
 0x71c   :  { %419 = vrot.lane.b32.xlu1 %v412_v57, %s1532_s26  ;;  %1390 = vst.msk [vmem:[%s2092_s5 + $0x8] sm:$0xff] %vm28_vm0, %v412_v57 }
 0x78e   :  { %v420_v59 = vpop.permute.xlu1 %419 }
 0x78f   :  { %v422_v60 = vsel %vm60_vm1, %v1391_v58, %v420_v59 }
 0x790   :  { %v423_v61 = vpack.c.bf16 %v422_v60, %v422_v60 }
 0x792   :  { %1392 = vmatmul.msk.bf16.vlgmr.msrb.gmra.mxu0 %vm123_vm2, %v423_v61  ;;  %1393 = vmatmul.msk.bf16.vlgmr.msrb.gmra.mxu1 %vm123_vm2, %v423_v61 }
 0x793   :  { %1029 = vmatpush.bf16.msrb.mxu0 %v1580_v3  ;;  %1042 = vmatpush.bf16.msrb.mxu1 %v1588_v6 }
 0x797   :  { %1030 = vmatpush.bf16.msrb.mxu0 %v1600_v10  ;;  %1043 = vmatpush.bf16.msrb.mxu1 %v1607_v12 }
 0x79b   :  { %1031 = vmatpush.bf16.msrb.mxu0 %v1623_v17  ;;  %1044 = vmatpush.bf16.msrb.mxu1 %v1627_v19 }
 0x79f   :  { %1032 = vmatpush.bf16.msrb.mxu0 %v1644_v24  ;;  %1045 = vmatpush.bf16.msrb.mxu1 %v1648_v25 }
 0x7a3   :  { %1033 = vmatpush.bf16.msrb.mxu0 %v1664_v30  ;;  %1046 = vmatpush.bf16.msrb.mxu1 %v1668_v31 }
 0x7a7   :  { %1034 = vmatpush.bf16.msrb.mxu0 %v1684_v35  ;;  %1047 = vmatpush.bf16.msrb.mxu1 %v1689_v37 }
 0x80f   :  { %v436_v62 = vpop.f32.mrf.mxu0  ;;  %v449_v63 = vpop.f32.mrf.mxu1 }
 0x810   :  { %v437_v0 = vadd.f32 %v436_v62, %v1740_v43  ;;  %v450_v1 = vadd.f32 %v449_v63, %v1742_v44 }
 0x812   :  { %v453_v2 = vmul.f32 %v437_v0, %v437_v0  ;;  %v454_v4 = vmul.f32 %v450_v1, %v450_v1 }
 0x814   :  { %v455_v5 = vadd.f32 %v454_v4, %v453_v2 }
 0x816   :  { %v456_v7 = vmax.f32 %v455_v5, 1e-16 }
 0x817   :  { %v438_v8 = vpop.f32.mrf.mxu0  ;;  %v451_v11 = vpop.f32.mrf.mxu1 }
 0x818   :  { %1460 = vrsqrt.f32 %v456_v7  ;;  %vm463_vm13 = vweird.f32 %v456_v7 }
 0x81e   :  { %v1461_v14 = vpop.eup %1460 }
 0x81f   :  { %v458_v15 = vmul.f32 %v1461_v14, %v456_v7  ;;  %vm464_vm12 = vweird.f32 %v1461_v14 }
 0x820   :  { %vm465_vm14 = vmor %vm463_vm13, %vm464_vm12 }
 0x821   :  { %v459_v16 = vmul.f32 %v1461_v14, %v458_v15 }
 0x823   :  { %v460_v18 = vmul.f32 0.5, %v459_v16 }
 0x825   :  { %v461_v20 = vsub.f32 1.5, %v460_v18 }
 0x827   :  { %v462_v36 = vmul.f32 %v1461_v14, %v461_v20 }
 0x829   :  { %v466_v45 = vsel %vm465_vm14, %v1461_v14, %v462_v36 }
 0x82a   :  { %v467_v22 = vmul.f32 %v466_v45, %v455_v5 }
 0x82c   :  { %v1394_v23 = vmul.f32 -1.442695, %v467_v22 }
 0x82e   :  { %1462 = vpow2.f32 %v1394_v23 }
 0x834   :  { %v1463_v26 = vpop.eup %1462 }
 0x835   :  { %v471_v27 = vadd.f32 1.0, %v1463_v26 }
 0x837   :  { %1464 = vrcp.f32 %v471_v27  ;;  %v483_v33 = vand.u32 2147483648, %v471_v27  ;;  %v481_v38 = vand.u32 2147483647, %v471_v27  ;;  %vm477_vm3 = vweird.f32 %v471_v27 }
 0x838   :  { %1466 = vtanh.f32 %v467_v22 }
 0x839   :  { %v484_v40 = vor.u32 1.1754944e-38, %v483_v33  ;;  %vm482_vm5 = vcmp.eq.f32.partialorder %v481_v38, 8.507059e+37 }
 0x83d   :  { %v1465_v28 = vpop.eup %1464 }
 0x83e   :  { %v473_v29 = vmul.f32 %v1465_v28, %v471_v27  ;;  %vm478_vm15 = vweird.f32 %v1465_v28  ;;  %v1467_v42 = vpop.eup %1466 }
 0x83f   :  { %vm479_vm4 = vmor %vm477_vm3, %vm478_vm15 }
 0x840   :  { %v474_v32 = vsub.f32 1.0, %v473_v29 }
 0x842   :  { %v475_v34 = vmul.f32 %v1465_v28, %v474_v32 }
 0x844   :  { %v476_v39 = vadd.f32 %v1465_v28, %v475_v34 }
 0x846   :  { %v480_v41 = vsel %vm479_vm4, %v1465_v28, %v476_v39  ;;  %v1396_v39 = vld [vmem:[%s2089_s0 + $0x18] sm:$0xff] }
 0x847   :  { %v485_v46 = vsel %vm482_vm5, %v484_v40, %v480_v41 }
 0x848   :  { %v488_v47 = vsel %vm52_vm8, %v485_v46, %v1467_v42 }
 0x849   :  { %v489_v48 = vmul.f32 %v488_v47, %v466_v45 }
 0x84b   :  { %v490_v49 = vmul.f32 %v489_v48, %v437_v0  ;;  %v491_v50 = vmul.f32 %v489_v48, %v450_v1 }
 0x84d   :  { %504 = vrot.lane.b32.xlu2 %v491_v50, %s1532_s26  ;;  %493 = vrot.lane.b32.xlu1 %v490_v49, %s1533_s4  ;;  %v502_v54 = vmul.f32 %v491_v50, %v413_v53 }
 0x855   :  { %497 = vrot.lane.b32.xlu2 %v490_v49, %s1532_s26 }
 0x8a7   :  { %v505_v51 = vpop.permute.xlu2 %504 }
 0x8a8   :  { %v507_v52 = vmul.f32 %v505_v51, %v491_v50 }
 0x8aa   :  { %509 = vrot.lane.b32.xlu0 %v507_v52, %s1532_s26 }
 0x8af   :  { %v498_v59 = vpop.permute.xlu2 %497 }
 0x8b0   :  { %v500_v61 = vmul.f32 %v498_v59, %v490_v49 }
 0x8bf   :  { %v494_v58 = vpop.permute.xlu1 %493 }
 0x8c0   :  { %v496_v60 = vmul.f32 %v494_v58, %v413_v53 }
 0x8c2   :  { %v1868_v62 = vadd.f32 %v500_v61, %v496_v60 }
 0x8c4   :  { %v513_v13 = vmul.f32 %v1868_v62, %v1868_v62 }
 0x91c   :  { %v510_v55 = vpop.permute.xlu0 %509 }
 0x91d   :  { %v1861_v56 = vadd.f32 %v510_v55, %v502_v54 }
 0x91f   :  { %536 = vrot.lane.b32.xlu1 %v1861_v56, %s1533_s4  ;;  %v514_v57 = vmul.f32 %v1861_v56, %v1861_v56 }
 0x921   :  { %516 = vrot.lane.b32.xlu0 %v514_v57, %s1533_s4 }
 0x991   :  { %v537_v18 = vpop.permute.xlu1 %536 }
 0x993   :  { %v517_v21 = vpop.permute.xlu0 %516 }
 0x994   :  { %v519_v63 = vadd.f32 %v517_v21, %v513_v13 }
 0x996   :  { %v520_v0 = vmax.f32 %v519_v63, 1e-16 }
 0x998   :  { %1468 = vrsqrt.f32 %v520_v0  ;;  %vm527_vm7 = vweird.f32 %v520_v0 }
 0x99e   :  { %v1469_v1 = vpop.eup %1468 }
 0x99f   :  { %v522_v2 = vmul.f32 %v1469_v1, %v520_v0  ;;  %vm528_vm6 = vweird.f32 %v1469_v1 }
 0x9a0   :  { %vm529_vm9 = vmor %vm527_vm7, %vm528_vm6 }
 0x9a1   :  { %v523_v4 = vmul.f32 %v1469_v1, %v522_v2 }
 0x9a3   :  { %v524_v5 = vmul.f32 0.5, %v523_v4 }
 0x9a5   :  { %v525_v7 = vsub.f32 1.5, %v524_v5 }
 0x9a7   :  { %v526_v8 = vmul.f32 %v1469_v1, %v525_v7 }
 0x9a9   :  { %v530_v11 = vsel %vm529_vm9, %v1469_v1, %v526_v8 }
 0x9aa   :  { %v531_v14 = vmul.f32 %v530_v11, %v519_v63 }
 0x9ac   :  { %1470 = vtanh.f32 %v531_v14  ;;  %v563_v14 = vsel %vm60_vm1, %v1868_v62, %v1861_v56 }
 0x9b2   :  { %v1471_v15 = vpop.eup %1470 }
 0x9b3   :  { %v533_v16 = vmul.f32 %v1471_v15, %v530_v11 }
 0x9b5   :  { %v534_v20 = vmul.f32 %v533_v16, %v1868_v62  ;;  %v539_v36 = vmul.f32 %v537_v18, %v533_v16 }
 0x9b7   :  { %541 = vrot.lane.b32.xlu2 %v534_v20, %s1534_s27  ;;  %546 = vrot.lane.b32.xlu0 %v539_v36, %s1534_s27 }
 0xa11   :  { %v542_v45 = vpop.permute.xlu2 %541 }
 0xa12   :  { %v544_v23 = vmul.f32 %v542_v45, %v490_v49  ;;  %v552_v26 = vmul.f32 %v542_v45, %v491_v50 }
 0xa29   :  { %v547_v22 = vpop.permute.xlu0 %546 }
 0xa2a   :  { %v549_v27 = vmul.f32 %v547_v22, %v491_v50  ;;  %v551_v28 = vmul.f32 %v547_v22, %v490_v49 }
 0xa2c   :  { %v550_v29 = vsub.f32 %v544_v23, %v549_v27  ;;  %v553_v32 = vadd.f32 %v552_v26, %v551_v28 }
 0xa2e   :  { %559 = vrot.lane.b32.xlu2 %v553_v32, %s1533_s4  ;;  %555 = vrot.lane.b32.xlu1 %v550_v29, %s1534_s27 }
 0xa88   :  { %v560_v33 = vpop.permute.xlu2 %559 }
 0xaa0   :  { %v556_v34 = vpop.permute.xlu1 %555 }
 0xaa1   :  { %v562_v38 = vsel %vm60_vm1, %v556_v34, %v560_v33 }
 0xaa2   :  { %569 = vrot.lane.b32.xlu0 %v562_v38, %s1532_s26  ;;  %1395 = vst.msk [vmem:[%s2092_s5 + $0x10] sm:$0xff] %vm28_vm0, %v562_v38 }
 0xb14   :  { %v570_v40 = vpop.permute.xlu0 %569 }
 0xb15   :  { %v572_v41 = vsel %vm60_vm1, %v1396_v39, %v570_v40 }
 0xb16   :  { %v573_v42 = vpack.c.bf16 %v572_v41, %v572_v41 }
 0xb18   :  { %1397 = vmatmul.msk.bf16.vlgmr.msrb.gmra.mxu2 %vm123_vm2, %v573_v42  ;;  %1398 = vmatmul.msk.bf16.vlgmr.msrb.gmra.mxu3 %vm123_vm2, %v573_v42 }
 0xb19   :  { %1179 = vmatpush.bf16.msrb.mxu2 %v1580_v3  ;;  %1192 = vmatpush.bf16.msrb.mxu3 %v1588_v6 }
 0xb1d   :  { %1180 = vmatpush.bf16.msrb.mxu2 %v1600_v10  ;;  %1193 = vmatpush.bf16.msrb.mxu3 %v1607_v12 }
 0xb21   :  { %1181 = vmatpush.bf16.msrb.mxu2 %v1623_v17  ;;  %1194 = vmatpush.bf16.msrb.mxu3 %v1627_v19 }
 0xb25   :  { %1182 = vmatpush.bf16.msrb.mxu2 %v1644_v24  ;;  %1195 = vmatpush.bf16.msrb.mxu3 %v1648_v25 }
 0xb29   :  { %1183 = vmatpush.bf16.msrb.mxu2 %v1664_v30  ;;  %1196 = vmatpush.bf16.msrb.mxu3 %v1668_v31 }
 0xb2d   :  { %1184 = vmatpush.bf16.msrb.mxu2 %v1684_v35  ;;  %1197 = vmatpush.bf16.msrb.mxu3 %v1689_v37 }
 0xb9b   :  { %v586_v3 = vpop.f32.mrf.mxu2  ;;  %v599_v6 = vpop.f32.mrf.mxu3 }
 0xb9c   :  { %v587_v10 = vadd.f32 %v586_v3, %v1740_v43  ;;  %v600_v12 = vadd.f32 %v599_v6, %v1742_v44 }
 0xb9e   :  { %v603_v17 = vmul.f32 %v587_v10, %v587_v10  ;;  %v604_v19 = vmul.f32 %v600_v12, %v600_v12 }
 0xba0   :  { %v605_v46 = vadd.f32 %v604_v19, %v603_v17 }
 0xba2   :  { %v606_v24 = vmax.f32 %v605_v46, 1e-16 }
 0xba3   :  { %v588_v47 = vpop.f32.mrf.mxu2  ;;  %v601_v25 = vpop.f32.mrf.mxu3 }
 0xba4   :  { %1472 = vrsqrt.f32 %v606_v24  ;;  %vm613_vm11 = vweird.f32 %v606_v24 }
 0xbaa   :  { %v1473_v30 = vpop.eup %1472 }
 0xbab   :  { %v608_v48 = vmul.f32 %v1473_v30, %v606_v24  ;;  %vm614_vm10 = vweird.f32 %v1473_v30 }
 0xbac   :  { %vm615_vm12 = vmor %vm613_vm11, %vm614_vm10 }
 0xbad   :  { %v609_v31 = vmul.f32 %v1473_v30, %v608_v48 }
 0xbaf   :  { %v610_v49 = vmul.f32 0.5, %v609_v31 }
 0xbb1   :  { %v611_v35 = vsub.f32 1.5, %v610_v49 }
 0xbb3   :  { %v612_v37 = vmul.f32 %v1473_v30, %v611_v35 }
 0xbb5   :  { %v616_v50 = vsel %vm615_vm12, %v1473_v30, %v612_v37  ;;  %v1401_v37 = vld [vmem:[%s2089_s0 + $0x20] sm:$0xff] }
 0xbb6   :  { %v617_v51 = vmul.f32 %v616_v50, %v605_v46 }
 0xbb8   :  { %v1399_v52 = vmul.f32 -1.442695, %v617_v51 }
 0xbba   :  { %1474 = vpow2.f32 %v1399_v52 }
 0xbc0   :  { %v1475_v53 = vpop.eup %1474 }
 0xbc1   :  { %v621_v54 = vadd.f32 1.0, %v1475_v53 }
 0xbc3   :  { %1476 = vrcp.f32 %v621_v54  ;;  %v633_v59 = vand.u32 2147483648, %v621_v54  ;;  %v631_v61 = vand.u32 2147483647, %v621_v54  ;;  %vm627_vm14 = vweird.f32 %v621_v54 }
 0xbc4   :  { %1478 = vtanh.f32 %v617_v51 }
 0xbc5   :  { %v634_v21 = vor.u32 1.1754944e-38, %v633_v59  ;;  %vm632_vm3 = vcmp.eq.f32.partialorder %v631_v61, 8.507059e+37 }
 0xbc9   :  { %v1477_v55 = vpop.eup %1476 }
 0xbca   :  { %v623_v57 = vmul.f32 %v1477_v55, %v621_v54  ;;  %vm628_vm13 = vweird.f32 %v1477_v55  ;;  %v1479_v0 = vpop.eup %1478 }
 0xbcb   :  { %vm629_vm15 = vmor %vm627_vm14, %vm628_vm13 }
 0xbcc   :  { %v624_v58 = vsub.f32 1.0, %v623_v57 }
 0xbce   :  { %v625_v60 = vmul.f32 %v1477_v55, %v624_v58 }
 0xbd0   :  { %v626_v13 = vadd.f32 %v1477_v55, %v625_v60 }
 0xbd2   :  { %v630_v63 = vsel %vm629_vm15, %v1477_v55, %v626_v13 }
 0xbd3   :  { %v635_v1 = vsel %vm632_vm3, %v634_v21, %v630_v63 }
 0xbd4   :  { %v638_v2 = vsel %vm52_vm8, %v635_v1, %v1479_v0 }
 0xbd5   :  { %v639_v4 = vmul.f32 %v638_v2, %v616_v50 }
 0xbd7   :  { %v640_v5 = vmul.f32 %v639_v4, %v587_v10  ;;  %v641_v7 = vmul.f32 %v639_v4, %v600_v12 }
 0xbd9   :  { %654 = vrot.lane.b32.xlu1 %v641_v7, %s1532_s26  ;;  %643 = vrot.lane.b32.xlu0 %v640_v5, %s1533_s4  ;;  %v652_v15 = vmul.f32 %v641_v7, %v563_v14 }
 0xbe1   :  { %647 = vrot.lane.b32.xlu1 %v640_v5, %s1532_s26 }
 0xc4b   :  { %v655_v8 = vpop.permute.xlu1 %654  ;;  %v644_v45 = vpop.permute.xlu0 %643 }
 0xc4c   :  { %v657_v11 = vmul.f32 %v655_v8, %v641_v7  ;;  %v646_v23 = vmul.f32 %v644_v45, %v563_v14 }
 0xc4e   :  { %659 = vrot.lane.b32.xlu2 %v657_v11, %s1532_s26 }
 0xc53   :  { %v648_v36 = vpop.permute.xlu1 %647 }
 0xc54   :  { %v650_v22 = vmul.f32 %v648_v36, %v640_v5 }
 0xc56   :  { %v1919_v26 = vadd.f32 %v650_v22, %v646_v23 }
 0xc58   :  { %v663_v56 = vmul.f32 %v1919_v26, %v1919_v26 }
 0xca8   :  { %v660_v16 = vpop.permute.xlu2 %659 }
 0xca9   :  { %v1912_v18 = vadd.f32 %v660_v16, %v652_v15 }
 0xcab   :  { %686 = vrot.lane.b32.xlu0 %v1912_v18, %s1533_s4  ;;  %v664_v20 = vmul.f32 %v1912_v18, %v1912_v18 }
 0xcad   :  { %666 = vrot.lane.b32.xlu2 %v664_v20, %s1533_s4 }
 0xd07   :  { %v667_v62 = vpop.permute.xlu2 %666 }
 0xd08   :  { %v669_v27 = vadd.f32 %v667_v62, %v663_v56 }
 0xd0a   :  { %v670_v28 = vmax.f32 %v669_v27, 1e-16 }
 0xd0c   :  { %1480 = vrsqrt.f32 %v670_v28  ;;  %vm677_vm5 = vweird.f32 %v670_v28 }
 0xd12   :  { %v1481_v29 = vpop.eup %1480 }
 0xd13   :  { %v672_v32 = vmul.f32 %v1481_v29, %v670_v28  ;;  %vm678_vm4 = vweird.f32 %v1481_v29 }
 0xd14   :  { %vm679_vm6 = vmor %vm677_vm5, %vm678_vm4 }
 0xd15   :  { %v673_v33 = vmul.f32 %v1481_v29, %v672_v32 }
 0xd17   :  { %v674_v34 = vmul.f32 0.5, %v673_v33 }
 0xd19   :  { %v675_v38 = vsub.f32 1.5, %v674_v34 }
 0xd1b   :  { %v676_v39 = vmul.f32 %v1481_v29, %v675_v38 }
 0xd1d   :  { %v680_v40 = vsel %vm679_vm6, %v1481_v29, %v676_v39  ;;  %v687_v6 = vpop.permute.xlu0 %686 }
 0xd1e   :  { %v681_v41 = vmul.f32 %v680_v40, %v669_v27 }
 0xd20   :  { %1482 = vtanh.f32 %v681_v41  ;;  %v713_v41 = vsel %vm60_vm1, %v1919_v26, %v1912_v18 }
 0xd26   :  { %v1483_v42 = vpop.eup %1482 }
 0xd27   :  { %v683_v3 = vmul.f32 %v1483_v42, %v680_v40 }
 0xd29   :  { %v689_v10 = vmul.f32 %v687_v6, %v683_v3  ;;  %v684_v12 = vmul.f32 %v683_v3, %v1919_v26 }
 0xd2b   :  { %691 = vrot.lane.b32.xlu1 %v684_v12, %s1534_s27  ;;  %696 = vrot.lane.b32.xlu2 %v689_v10, %s1534_s27 }
 0xd85   :  { %v697_v17 = vpop.permute.xlu2 %696 }
 0xd86   :  { %v699_v46 = vmul.f32 %v697_v17, %v641_v7  ;;  %v701_v24 = vmul.f32 %v697_v17, %v640_v5 }
 0xd9d   :  { %v692_v19 = vpop.permute.xlu1 %691 }
 0xd9e   :  { %v694_v47 = vmul.f32 %v692_v19, %v640_v5  ;;  %v702_v25 = vmul.f32 %v692_v19, %v641_v7 }
 0xda0   :  { %v700_v30 = vsub.f32 %v694_v47, %v699_v46  ;;  %v703_v48 = vadd.f32 %v702_v25, %v701_v24 }
 0xda2   :  { %709 = vrot.lane.b32.xlu1 %v703_v48, %s1533_s4  ;;  %705 = vrot.lane.b32.xlu0 %v700_v30, %s1534_s27 }
 0xe14   :  { %v710_v31 = vpop.permute.xlu1 %709  ;;  %v706_v49 = vpop.permute.xlu0 %705 }
 0xe15   :  { %v712_v35 = vsel %vm60_vm1, %v706_v49, %v710_v31 }
 0xe16   :  { %719 = vrot.lane.b32.xlu2 %v712_v35, %s1532_s26  ;;  %1400 = vst.msk [vmem:[%s2092_s5 + $0x18] sm:$0xff] %vm28_vm0, %v712_v35 }
 0xe70   :  { %v720_v50 = vpop.permute.xlu2 %719 }
 0xe71   :  { %v722_v51 = vsel %vm60_vm1, %v1401_v37, %v720_v50 }
 0xe72   :  { %v723_v52 = vpack.c.bf16 %v722_v51, %v722_v51 }
 0xe74   :  { %1402 = vmatmul.msk.bf16.vlgmr.msra.gmra.mxu0 %vm123_vm2, %v723_v52  ;;  %1403 = vmatmul.msk.bf16.vlgmr.msra.gmra.mxu1 %vm123_vm2, %v723_v52 }
 0xef1   :  { %v736_v53 = vpop.f32.mrf.mxu0  ;;  %v749_v54 = vpop.f32.mrf.mxu1 }
 0xef2   :  { %v737_v55 = vadd.f32 %v736_v53, %v1740_v43  ;;  %v750_v57 = vadd.f32 %v749_v54, %v1742_v44 }
 0xef4   :  { %v753_v58 = vmul.f32 %v737_v55, %v737_v55  ;;  %v754_v59 = vmul.f32 %v750_v57, %v750_v57 }
 0xef6   :  { %v755_v60 = vadd.f32 %v754_v59, %v753_v58 }
 0xef8   :  { %v756_v61 = vmax.f32 %v755_v60, 1e-16 }
 0xef9   :  { %v738_v13 = vpop.f32.mrf.mxu0  ;;  %v751_v21 = vpop.f32.mrf.mxu1 }
 0xefa   :  { %1484 = vrsqrt.f32 %v756_v61  ;;  %vm763_vm9 = vweird.f32 %v756_v61 }
 0xf00   :  { %v1485_v63 = vpop.eup %1484 }
 0xf01   :  { %v758_v0 = vmul.f32 %v1485_v63, %v756_v61  ;;  %vm764_vm7 = vweird.f32 %v1485_v63 }
 0xf02   :  { %vm765_vm10 = vmor %vm763_vm9, %vm764_vm7 }
 0xf03   :  { %v759_v1 = vmul.f32 %v1485_v63, %v758_v0 }
 0xf05   :  { %v760_v2 = vmul.f32 0.5, %v759_v1 }
 0xf07   :  { %v761_v4 = vsub.f32 1.5, %v760_v2 }
 0xf09   :  { %v762_v5 = vmul.f32 %v1485_v63, %v761_v4 }
 0xf0b   :  { %v766_v7 = vsel %vm765_vm10, %v1485_v63, %v762_v5  ;;  %v1406_v5 = vld [vmem:[%s2089_s0 + $0x28] sm:$0xff] }
 0xf0c   :  { %v767_v8 = vmul.f32 %v766_v7, %v755_v60 }
 0xf0e   :  { %v1404_v11 = vmul.f32 -1.442695, %v767_v8 }
 0xf10   :  { %1486 = vpow2.f32 %v1404_v11 }
 0xf16   :  { %v1487_v14 = vpop.eup %1486 }
 0xf17   :  { %v771_v15 = vadd.f32 1.0, %v1487_v14 }
 0xf19   :  { %1488 = vrcp.f32 %v771_v15  ;;  %v783_v45 = vand.u32 2147483648, %v771_v15  ;;  %v781_v23 = vand.u32 2147483647, %v771_v15  ;;  %vm777_vm12 = vweird.f32 %v771_v15 }
 0xf1a   :  { %1490 = vtanh.f32 %v767_v8 }
 0xf1b   :  { %v784_v62 = vor.u32 1.1754944e-38, %v783_v45  ;;  %vm782_vm14 = vcmp.eq.f32.partialorder %v781_v23, 8.507059e+37 }
 0xf1f   :  { %v1489_v16 = vpop.eup %1488 }
 0xf20   :  { %v773_v20 = vmul.f32 %v1489_v16, %v771_v15  ;;  %vm778_vm11 = vweird.f32 %v1489_v16  ;;  %v1491_v28 = vpop.eup %1490 }
 0xf21   :  { %vm779_vm13 = vmor %vm777_vm12, %vm778_vm11 }
 0xf22   :  { %v774_v36 = vsub.f32 1.0, %v773_v20 }
 0xf24   :  { %v775_v22 = vmul.f32 %v1489_v16, %v774_v36 }
 0xf26   :  { %v776_v56 = vadd.f32 %v1489_v16, %v775_v22 }
 0xf28   :  { %v780_v27 = vsel %vm779_vm13, %v1489_v16, %v776_v56 }
 0xf29   :  { %v785_v29 = vsel %vm782_vm14, %v784_v62, %v780_v27 }
 0xf2a   :  { %v788_v32 = vsel %vm52_vm8, %v785_v29, %v1491_v28 }
 0xf2b   :  { %v789_v33 = vmul.f32 %v788_v32, %v766_v7 }
 0xf2d   :  { %v790_v34 = vmul.f32 %v789_v33, %v737_v55  ;;  %v791_v38 = vmul.f32 %v789_v33, %v750_v57 }
 0xf2f   :  { %804 = vrot.lane.b32.xlu0 %v791_v38, %s1532_s26  ;;  %793 = vrot.lane.b32.xlu2 %v790_v34, %s1533_s4  ;;  %v802_v42 = vmul.f32 %v791_v38, %v713_v41 }
 0xf37   :  { %797 = vrot.lane.b32.xlu0 %v790_v34, %s1532_s26 }
 0xf89   :  { %v794_v17 = vpop.permute.xlu2 %793 }
 0xf8a   :  { %v796_v46 = vmul.f32 %v794_v17, %v713_v41 }
 0xfa1   :  { %v805_v39 = vpop.permute.xlu0 %804 }
 0xfa2   :  { %v807_v40 = vmul.f32 %v805_v39, %v791_v38 }
 0xfa4   :  { %809 = vrot.lane.b32.xlu1 %v807_v40, %s1532_s26 }
 0xfa9   :  { %v798_v12 = vpop.permute.xlu0 %797 }
 0xfaa   :  { %v800_v19 = vmul.f32 %v798_v12, %v790_v34 }
 0xfac   :  { %v1958_v24 = vadd.f32 %v800_v19, %v796_v46 }
 0xfae   :  { %v813_v18 = vmul.f32 %v1958_v24, %v1958_v24 }
0x1016   :  { %v810_v3 = vpop.permute.xlu1 %809 }
0x1017   :  { %v1951_v6 = vadd.f32 %v810_v3, %v802_v42 }
0x1019   :  { %836 = vrot.lane.b32.xlu2 %v1951_v6, %s1533_s4  ;;  %v814_v10 = vmul.f32 %v1951_v6, %v1951_v6 }
0x101b   :  { %816 = vrot.lane.b32.xlu1 %v814_v10, %s1533_s4 }
0x1073   :  { %v837_v54 = vpop.permute.xlu2 %836 }
0x108d   :  { %v817_v26 = vpop.permute.xlu1 %816 }
0x108e   :  { %v819_v47 = vadd.f32 %v817_v26, %v813_v18 }
0x1090   :  { %v820_v25 = vmax.f32 %v819_v47, 1e-16 }
0x1092   :  { %1492 = vrsqrt.f32 %v820_v25  ;;  %vm827_vm3 = vweird.f32 %v820_v25 }
0x1098   :  { %v1493_v30 = vpop.eup %1492 }
0x1099   :  { %v822_v48 = vmul.f32 %v1493_v30, %v820_v25  ;;  %vm828_vm15 = vweird.f32 %v1493_v30 }
0x109a   :  { %vm829_vm4 = vmor %vm827_vm3, %vm828_vm15 }
0x109b   :  { %v823_v31 = vmul.f32 %v1493_v30, %v822_v48 }
0x109d   :  { %v824_v49 = vmul.f32 0.5, %v823_v31 }
0x109f   :  { %v825_v35 = vsub.f32 1.5, %v824_v49 }
0x10a1   :  { %v826_v37 = vmul.f32 %v1493_v30, %v825_v35 }
0x10a3   :  { %v830_v50 = vsel %vm829_vm4, %v1493_v30, %v826_v37 }
0x10a4   :  { %v831_v51 = vmul.f32 %v830_v50, %v819_v47 }
0x10a6   :  { %1494 = vtanh.f32 %v831_v51  ;;  %v863_v51 = vsel %vm60_vm1, %v1958_v24, %v1951_v6 }
0x10ac   :  { %v1495_v52 = vpop.eup %1494 }
0x10ad   :  { %v833_v53 = vmul.f32 %v1495_v52, %v830_v50 }
0x10af   :  { %v834_v55 = vmul.f32 %v833_v53, %v1958_v24  ;;  %v839_v57 = vmul.f32 %v837_v54, %v833_v53 }
0x10b1   :  { %841 = vrot.lane.b32.xlu0 %v834_v55, %s1534_s27  ;;  %846 = vrot.lane.b32.xlu1 %v839_v57, %s1534_s27 }
0x1123   :  { %v842_v58 = vpop.permute.xlu0 %841  ;;  %v847_v59 = vpop.permute.xlu1 %846 }
0x1124   :  { %v844_v60 = vmul.f32 %v842_v58, %v790_v34  ;;  %v852_v61 = vmul.f32 %v842_v58, %v791_v38  ;;  %v849_v13 = vmul.f32 %v847_v59, %v791_v38  ;;  %v851_v21 = vmul.f32 %v847_v59, %v790_v34 }
0x1126   :  { %v850_v63 = vsub.f32 %v844_v60, %v849_v13  ;;  %v853_v0 = vadd.f32 %v852_v61, %v851_v21 }
0x1128   :  { %859 = vrot.lane.b32.xlu0 %v853_v0, %s1533_s4  ;;  %855 = vrot.lane.b32.xlu2 %v850_v63, %s1534_s27 }
0x1182   :  { %v856_v1 = vpop.permute.xlu2 %855 }
0x119a   :  { %v860_v2 = vpop.permute.xlu0 %859 }
0x119b   :  { %v862_v4 = vsel %vm60_vm1, %v856_v1, %v860_v2 }
0x119c   :  { %869 = vrot.lane.b32.xlu1 %v862_v4, %s1532_s26  ;;  %1405 = vst.msk [vmem:[%s2092_s5 + $0x20] sm:$0xff] %vm28_vm0, %v862_v4 }
0x120e   :  { %v870_v7 = vpop.permute.xlu1 %869 }
0x120f   :  { %v872_v8 = vsel %vm60_vm1, %v1406_v5, %v870_v7 }
0x1210   :  { %v873_v11 = vpack.c.bf16 %v872_v8, %v872_v8 }
0x1212   :  { %1407 = vmatmul.msk.bf16.vlgmr.msra.gmra.mxu2 %vm123_vm2, %v873_v11  ;;  %1408 = vmatmul.msk.bf16.vlgmr.msra.gmra.mxu3 %vm123_vm2, %v873_v11 }
0x1295   :  { %v886_v14 = vpop.f32.mrf.mxu2  ;;  %v899_v15 = vpop.f32.mrf.mxu3 }
0x1296   :  { %v887_v16 = vadd.f32 %v886_v14, %v1740_v43  ;;  %v900_v20 = vadd.f32 %v899_v15, %v1742_v44 }
0x1298   :  { %v903_v36 = vmul.f32 %v887_v16, %v887_v16  ;;  %v904_v45 = vmul.f32 %v900_v20, %v900_v20 }
0x129a   :  { %v905_v22 = vadd.f32 %v904_v45, %v903_v36 }
0x129c   :  { %v906_v23 = vmax.f32 %v905_v22, 1e-16 }
0x129d   :  { %v888_v56 = vpop.f32.mrf.mxu2  ;;  %v901_v62 = vpop.f32.mrf.mxu3 }
0x129e   :  { %1496 = vrsqrt.f32 %v906_v23  ;;  %vm913_vm6 = vweird.f32 %v906_v23 }
0x12a4   :  { %v1497_v27 = vpop.eup %1496 }
0x12a5   :  { %v908_v28 = vmul.f32 %v1497_v27, %v906_v23  ;;  %vm914_vm5 = vweird.f32 %v1497_v27 }
0x12a6   :  { %vm915_vm7 = vmor %vm913_vm6, %vm914_vm5 }
0x12a7   :  { %v909_v29 = vmul.f32 %v1497_v27, %v908_v28 }
0x12a9   :  { %v910_v32 = vmul.f32 0.5, %v909_v29 }
0x12ab   :  { %v911_v33 = vsub.f32 1.5, %v910_v32 }
0x12ad   :  { %v912_v34 = vmul.f32 %v1497_v27, %v911_v33 }
0x12af   :  { %v916_v38 = vsel %vm915_vm7, %v1497_v27, %v912_v34  ;;  %v1411_v34 = vld [vmem:[%s2089_s0 + $0x30] sm:$0xff] }
0x12b0   :  { %v917_v39 = vmul.f32 %v916_v38, %v905_v22 }
0x12b2   :  { %v1409_v40 = vmul.f32 -1.442695, %v917_v39 }
0x12b4   :  { %1498 = vpow2.f32 %v1409_v40 }
0x12ba   :  { %v1499_v41 = vpop.eup %1498 }
0x12bb   :  { %v921_v42 = vadd.f32 1.0, %v1499_v41 }
0x12bd   :  { %1500 = vrcp.f32 %v921_v42  ;;  %v933_v17 = vand.u32 2147483648, %v921_v42  ;;  %v931_v46 = vand.u32 2147483647, %v921_v42  ;;  %vm927_vm10 = vweird.f32 %v921_v42 }
0x12be   :  { %1502 = vtanh.f32 %v917_v39 }
0x12bf   :  { %v934_v26 = vor.u32 1.1754944e-38, %v933_v17  ;;  %vm932_vm12 = vcmp.eq.f32.partialorder %v931_v46, 8.507059e+37 }
0x12c3   :  { %v1501_v3 = vpop.eup %1500 }
0x12c4   :  { %v923_v10 = vmul.f32 %v1501_v3, %v921_v42  ;;  %vm928_vm9 = vweird.f32 %v1501_v3  ;;  %v1503_v25 = vpop.eup %1502 }
0x12c5   :  { %vm929_vm11 = vmor %vm927_vm10, %vm928_vm9 }
0x12c6   :  { %v924_v12 = vsub.f32 1.0, %v923_v10 }
0x12c8   :  { %v925_v19 = vmul.f32 %v1501_v3, %v924_v12 }
0x12ca   :  { %v926_v18 = vadd.f32 %v1501_v3, %v925_v19 }
0x12cc   :  { %v930_v47 = vsel %vm929_vm11, %v1501_v3, %v926_v18 }
0x12cd   :  { %v935_v30 = vsel %vm932_vm12, %v934_v26, %v930_v47 }
0x12ce   :  { %v938_v48 = vsel %vm52_vm8, %v935_v30, %v1503_v25 }
0x12cf   :  { %v939_v31 = vmul.f32 %v938_v48, %v916_v38 }
0x12d1   :  { %v940_v49 = vmul.f32 %v939_v31, %v887_v16  ;;  %v941_v35 = vmul.f32 %v939_v31, %v900_v20 }
0x12d3   :  { %954 = vrot.lane.b32.xlu2 %v941_v35, %s1532_s26  ;;  %943 = vrot.lane.b32.xlu1 %v940_v49, %s1533_s4  ;;  %v952_v52 = vmul.f32 %v941_v35, %v863_v51 }
0x12db   :  { %947 = vrot.lane.b32.xlu2 %v940_v49, %s1532_s26 }
0x132d   :  { %v955_v37 = vpop.permute.xlu2 %954 }
0x132e   :  { %v957_v50 = vmul.f32 %v955_v37, %v941_v35 }
0x1330   :  { %959 = vrot.lane.b32.xlu0 %v957_v50, %s1532_s26 }
0x1335   :  { %v948_v58 = vpop.permute.xlu2 %947 }
0x1336   :  { %v950_v60 = vmul.f32 %v948_v58, %v940_v49 }
0x1345   :  { %v944_v57 = vpop.permute.xlu1 %943 }
0x1346   :  { %v946_v59 = vmul.f32 %v944_v57, %v863_v51 }
0x1348   :  { %v1997_v61 = vadd.f32 %v950_v60, %v946_v59 }
0x134a   :  { %v963_v6 = vmul.f32 %v1997_v61, %v1997_v61 }
0x13a2   :  { %v960_v53 = vpop.permute.xlu0 %959 }
0x13a3   :  { %v1990_v54 = vadd.f32 %v960_v53, %v952_v52 }
0x13a5   :  { %986 = vrot.lane.b32.xlu1 %v1990_v54, %s1533_s4  ;;  %v964_v55 = vmul.f32 %v1990_v54, %v1990_v54 }
0x13a7   :  { %966 = vrot.lane.b32.xlu0 %v964_v55, %s1533_s4 }
0x1417   :  { %v987_v15 = vpop.permute.xlu1 %986 }
0x1419   :  { %v967_v24 = vpop.permute.xlu0 %966 }
0x141a   :  { %v969_v13 = vadd.f32 %v967_v24, %v963_v6 }
0x141c   :  { %v970_v21 = vmax.f32 %v969_v13, 1e-16 }
0x141e   :  { %1504 = vrsqrt.f32 %v970_v21  ;;  %vm977_vm14 = vweird.f32 %v970_v21 }
0x1424   :  { %v1505_v63 = vpop.eup %1504 }
0x1425   :  { %v972_v0 = vmul.f32 %v1505_v63, %v970_v21  ;;  %vm978_vm13 = vweird.f32 %v1505_v63 }
0x1426   :  { %vm979_vm15 = vmor %vm977_vm14, %vm978_vm13 }
0x1427   :  { %v973_v1 = vmul.f32 %v1505_v63, %v972_v0 }
0x1429   :  { %v974_v2 = vmul.f32 0.5, %v973_v1 }
0x142b   :  { %v975_v4 = vsub.f32 1.5, %v974_v2 }
0x142d   :  { %v976_v5 = vmul.f32 %v1505_v63, %v975_v4 }
0x142f   :  { %v980_v7 = vsel %vm979_vm15, %v1505_v63, %v976_v5 }
0x1430   :  { %v981_v8 = vmul.f32 %v980_v7, %v969_v13 }
0x1432   :  { %1506 = vtanh.f32 %v981_v8  ;;  %v1013_v8 = vsel %vm60_vm1, %v1997_v61, %v1990_v54 }
0x1438   :  { %v1507_v11 = vpop.eup %1506 }
0x1439   :  { %v983_v14 = vmul.f32 %v1507_v11, %v980_v7 }
0x143b   :  { %v984_v16 = vmul.f32 %v983_v14, %v1997_v61  ;;  %v989_v20 = vmul.f32 %v987_v15, %v983_v14 }
0x143d   :  { %991 = vrot.lane.b32.xlu2 %v984_v16, %s1534_s27  ;;  %996 = vrot.lane.b32.xlu0 %v989_v20, %s1534_s27 }
0x1497   :  { %v992_v36 = vpop.permute.xlu2 %991 }
0x1498   :  { %v994_v22 = vmul.f32 %v992_v36, %v940_v49  ;;  %v1002_v23 = vmul.f32 %v992_v36, %v941_v35 }
0x14af   :  { %v997_v45 = vpop.permute.xlu0 %996 }
0x14b0   :  { %v999_v56 = vmul.f32 %v997_v45, %v941_v35  ;;  %v1001_v62 = vmul.f32 %v997_v45, %v940_v49 }
0x14b2   :  { %v1000_v27 = vsub.f32 %v994_v22, %v999_v56  ;;  %v1003_v28 = vadd.f32 %v1002_v23, %v1001_v62 }
0x14b4   :  { %1009 = vrot.lane.b32.xlu2 %v1003_v28, %s1533_s4  ;;  %1005 = vrot.lane.b32.xlu1 %v1000_v27, %s1534_s27 }
0x150e   :  { %v1010_v29 = vpop.permute.xlu2 %1009 }
0x1526   :  { %v1006_v32 = vpop.permute.xlu1 %1005 }
0x1527   :  { %v1012_v33 = vsel %vm60_vm1, %v1006_v32, %v1010_v29 }
0x1528   :  { %1019 = vrot.lane.b32.xlu0 %v1012_v33, %s1532_s26  ;;  %1410 = vst.msk [vmem:[%s2092_s5 + $0x28] sm:$0xff] %vm28_vm0, %v1012_v33 }
0x159a   :  { %v1020_v38 = vpop.permute.xlu0 %1019 }
0x159b   :  { %v1022_v39 = vsel %vm60_vm1, %v1411_v34, %v1020_v38 }
0x159c   :  { %v1023_v40 = vpack.c.bf16 %v1022_v39, %v1022_v39 }
0x159e   :  { %1412 = vmatmul.msk.bf16.vlgmr.msrb.gmra.mxu0 %vm123_vm2, %v1023_v40  ;;  %1413 = vmatmul.msk.bf16.vlgmr.msrb.gmra.mxu1 %vm123_vm2, %v1023_v40 }
0x161b   :  { %v1036_v41 = vpop.f32.mrf.mxu0  ;;  %v1049_v42 = vpop.f32.mrf.mxu1 }
0x161c   :  { %v1037_v3 = vadd.f32 %v1036_v41, %v1740_v43  ;;  %v1050_v10 = vadd.f32 %v1049_v42, %v1742_v44 }
0x161e   :  { %v1053_v12 = vmul.f32 %v1037_v3, %v1037_v3  ;;  %v1054_v17 = vmul.f32 %v1050_v10, %v1050_v10 }
0x1620   :  { %v1055_v19 = vadd.f32 %v1054_v17, %v1053_v12 }
0x1622   :  { %v1056_v46 = vmax.f32 %v1055_v19, 1e-16 }
0x1623   :  { %v1038_v18 = vpop.f32.mrf.mxu0  ;;  %v1051_v26 = vpop.f32.mrf.mxu1 }
0x1624   :  { %1508 = vrsqrt.f32 %v1056_v46  ;;  %vm1063_vm4 = vweird.f32 %v1056_v46 }
0x162a   :  { %v1509_v47 = vpop.eup %1508 }
0x162b   :  { %v1058_v25 = vmul.f32 %v1509_v47, %v1056_v46  ;;  %vm1064_vm3 = vweird.f32 %v1509_v47 }
0x162c   :  { %vm1065_vm5 = vmor %vm1063_vm4, %vm1064_vm3 }
0x162d   :  { %v1059_v30 = vmul.f32 %v1509_v47, %v1058_v25 }
0x162f   :  { %v1060_v48 = vmul.f32 0.5, %v1059_v30 }
0x1631   :  { %v1061_v31 = vsub.f32 1.5, %v1060_v48 }
0x1633   :  { %v1062_v49 = vmul.f32 %v1509_v47, %v1061_v31 }
0x1635   :  { %v1066_v35 = vsel %vm1065_vm5, %v1509_v47, %v1062_v49  ;;  %v1416_v49 = vld [vmem:[%s2089_s0 + $0x38] sm:$0xff] }
0x1636   :  { %v1067_v37 = vmul.f32 %v1066_v35, %v1055_v19 }
0x1638   :  { %v1414_v50 = vmul.f32 -1.442695, %v1067_v37 }
0x163a   :  { %1510 = vpow2.f32 %v1414_v50 }
0x1640   :  { %v1511_v51 = vpop.eup %1510 }
0x1641   :  { %v1071_v52 = vadd.f32 1.0, %v1511_v51 }
0x1643   :  { %1512 = vrcp.f32 %v1071_v52  ;;  %v1083_v58 = vand.u32 2147483648, %v1071_v52  ;;  %v1081_v60 = vand.u32 2147483647, %v1071_v52  ;;  %vm1077_vm7 = vweird.f32 %v1071_v52 }
0x1644   :  { %1514 = vtanh.f32 %v1067_v37 }
0x1645   :  { %v1084_v24 = vor.u32 1.1754944e-38, %v1083_v58  ;;  %vm1082_vm10 = vcmp.eq.f32.partialorder %v1081_v60, 8.507059e+37 }
0x1649   :  { %v1513_v53 = vpop.eup %1512 }
0x164a   :  { %v1073_v55 = vmul.f32 %v1513_v53, %v1071_v52  ;;  %vm1078_vm6 = vweird.f32 %v1513_v53  ;;  %v1515_v21 = vpop.eup %1514 }
0x164b   :  { %vm1079_vm9 = vmor %vm1077_vm7, %vm1078_vm6 }
0x164c   :  { %v1074_v57 = vsub.f32 1.0, %v1073_v55 }
0x164e   :  { %v1075_v59 = vmul.f32 %v1513_v53, %v1074_v57 }
0x1650   :  { %v1076_v6 = vadd.f32 %v1513_v53, %v1075_v59 }
0x1652   :  { %v1080_v13 = vsel %vm1079_vm9, %v1513_v53, %v1076_v6 }
0x1653   :  { %v1085_v63 = vsel %vm1082_vm10, %v1084_v24, %v1080_v13 }
0x1654   :  { %v1088_v0 = vsel %vm52_vm8, %v1085_v63, %v1515_v21 }
0x1655   :  { %v1089_v1 = vmul.f32 %v1088_v0, %v1066_v35 }
0x1657   :  { %v1090_v2 = vmul.f32 %v1089_v1, %v1037_v3  ;;  %v1091_v4 = vmul.f32 %v1089_v1, %v1050_v10 }
0x1659   :  { %1104 = vrot.lane.b32.xlu1 %v1091_v4, %s1532_s26  ;;  %1093 = vrot.lane.b32.xlu0 %v1090_v2, %s1533_s4  ;;  %v1102_v11 = vmul.f32 %v1091_v4, %v1013_v8 }
0x1661   :  { %1097 = vrot.lane.b32.xlu1 %v1090_v2, %s1532_s26 }
0x16cb   :  { %v1105_v5 = vpop.permute.xlu1 %1104  ;;  %v1094_v36 = vpop.permute.xlu0 %1093 }
0x16cc   :  { %v1107_v7 = vmul.f32 %v1105_v5, %v1091_v4  ;;  %v1096_v22 = vmul.f32 %v1094_v36, %v1013_v8 }
0x16ce   :  { %1109 = vrot.lane.b32.xlu2 %v1107_v7, %s1532_s26 }
0x16d3   :  { %v1098_v20 = vpop.permute.xlu1 %1097 }
0x16d4   :  { %v1100_v45 = vmul.f32 %v1098_v20, %v1090_v2 }
0x16d6   :  { %v2036_v23 = vadd.f32 %v1100_v45, %v1096_v22 }
0x16d8   :  { %v1113_v54 = vmul.f32 %v2036_v23, %v2036_v23 }
0x1728   :  { %v1110_v14 = vpop.permute.xlu2 %1109 }
0x1729   :  { %v2029_v15 = vadd.f32 %v1110_v14, %v1102_v11 }
0x172b   :  { %1136 = vrot.lane.b32.xlu0 %v2029_v15, %s1533_s4  ;;  %v1114_v16 = vmul.f32 %v2029_v15, %v2029_v15  ;;  %v1163_v9 = vsel %vm60_vm1, %v2036_v23, %v2029_v15 }
0x172d   :  { %1116 = vrot.lane.b32.xlu2 %v1114_v16, %s1533_s4 }
0x1787   :  { %v1117_v61 = vpop.permute.xlu2 %1116 }
0x1788   :  { %v1119_v56 = vadd.f32 %v1117_v61, %v1113_v54 }
0x178a   :  { %v1120_v62 = vmax.f32 %v1119_v56, 1e-16 }
0x178c   :  { %1516 = vrsqrt.f32 %v1120_v62  ;;  %vm1127_vm12 = vweird.f32 %v1120_v62 }
0x1792   :  { %v1517_v27 = vpop.eup %1516 }
0x1793   :  { %v1122_v28 = vmul.f32 %v1517_v27, %v1120_v62  ;;  %vm1128_vm11 = vweird.f32 %v1517_v27 }
0x1794   :  { %vm1129_vm13 = vmor %vm1127_vm12, %vm1128_vm11 }
0x1795   :  { %v1123_v29 = vmul.f32 %v1517_v27, %v1122_v28 }
0x1797   :  { %v1124_v32 = vmul.f32 0.5, %v1123_v29 }
0x1799   :  { %v1125_v33 = vsub.f32 1.5, %v1124_v32 }
0x179b   :  { %v1126_v34 = vmul.f32 %v1517_v27, %v1125_v33 }
0x179d   :  { %v1130_v38 = vsel %vm1129_vm13, %v1517_v27, %v1126_v34  ;;  %v1137_v42 = vpop.permute.xlu0 %1136 }
0x179e   :  { %v1131_v39 = vmul.f32 %v1130_v38, %v1119_v56 }
0x17a0   :  { %1518 = vtanh.f32 %v1131_v39 }
0x17a6   :  { %v1519_v40 = vpop.eup %1518 }
0x17a7   :  { %v1133_v41 = vmul.f32 %v1519_v40, %v1130_v38 }
0x17a9   :  { %v1139_v3 = vmul.f32 %v1137_v42, %v1133_v41  ;;  %v1134_v10 = vmul.f32 %v1133_v41, %v2036_v23 }
0x17ab   :  { %1141 = vrot.lane.b32.xlu1 %v1134_v10, %s1534_s27  ;;  %1146 = vrot.lane.b32.xlu2 %v1139_v3, %s1534_s27 }
0x1805   :  { %v1147_v12 = vpop.permute.xlu2 %1146 }
0x1806   :  { %v1149_v19 = vmul.f32 %v1147_v12, %v1091_v4  ;;  %v1151_v46 = vmul.f32 %v1147_v12, %v1090_v2 }
0x181d   :  { %v1142_v17 = vpop.permute.xlu1 %1141 }
0x181e   :  { %v1144_v18 = vmul.f32 %v1142_v17, %v1090_v2  ;;  %v1152_v26 = vmul.f32 %v1142_v17, %v1091_v4 }
0x1820   :  { %v1150_v47 = vsub.f32 %v1144_v18, %v1149_v19  ;;  %v1153_v25 = vadd.f32 %v1152_v26, %v1151_v46 }
0x1822   :  { %1159 = vrot.lane.b32.xlu1 %v1153_v25, %s1533_s4  ;;  %1155 = vrot.lane.b32.xlu0 %v1150_v47, %s1534_s27 }
0x1894   :  { %v1160_v30 = vpop.permute.xlu1 %1159  ;;  %v1156_v48 = vpop.permute.xlu0 %1155 }
0x1895   :  { %v1162_v31 = vsel %vm60_vm1, %v1156_v48, %v1160_v30 }
0x1896   :  { %1169 = vrot.lane.b32.xlu2 %v1162_v31, %s1532_s26  ;;  %1415 = vst.msk [vmem:[%s2092_s5 + $0x30] sm:$0xff] %vm28_vm0, %v1162_v31 }
0x18f0   :  { %v1170_v35 = vpop.permute.xlu2 %1169 }
0x18f1   :  { %v1172_v37 = vsel %vm60_vm1, %v1416_v49, %v1170_v35 }
0x18f2   :  { %v1173_v50 = vpack.c.bf16 %v1172_v37, %v1172_v37 }
0x18f4   :  { %1417 = vmatmul.msk.bf16.vlgmr.msrb.gmra.mxu2 %vm123_vm2, %v1173_v50  ;;  %1418 = vmatmul.msk.bf16.vlgmr.msrb.gmra.mxu3 %vm123_vm2, %v1173_v50 }
0x1977   :  { %v1186_v51 = vpop.f32.mrf.mxu2  ;;  %v1199_v52 = vpop.f32.mrf.mxu3 }
0x1978   :  { %v1187_v53 = vadd.f32 %v1186_v51, %v1740_v43  ;;  %v1200_v55 = vadd.f32 %v1199_v52, %v1742_v44 }
0x197a   :  { %v1203_v57 = vmul.f32 %v1187_v53, %v1187_v53  ;;  %v1204_v58 = vmul.f32 %v1200_v55, %v1200_v55 }
0x197c   :  { %v1205_v59 = vadd.f32 %v1204_v58, %v1203_v57 }
0x197e   :  { %v1206_v60 = vmax.f32 %v1205_v59, 1e-16 }
0x197f   :  { %v1188_v6 = vpop.f32.mrf.mxu2  ;;  %v1201_v24 = vpop.f32.mrf.mxu3 }
0x1980   :  { %1520 = vrsqrt.f32 %v1206_v60  ;;  %vm1213_vm2 = vweird.f32 %v1206_v60 }
0x1986   :  { %v1521_v13 = vpop.eup %1520 }
0x1987   :  { %v1208_v21 = vmul.f32 %v1521_v13, %v1206_v60  ;;  %vm1214_vm14 = vweird.f32 %v1521_v13 }
0x1988   :  { %vm1215_vm15 = vmor %vm1213_vm2, %vm1214_vm14 }
0x1989   :  { %v1209_v63 = vmul.f32 %v1521_v13, %v1208_v21 }
0x198b   :  { %v1210_v0 = vmul.f32 0.5, %v1209_v63 }
0x198d   :  { %v1211_v1 = vsub.f32 1.5, %v1210_v0 }
0x198f   :  { %v1212_v2 = vmul.f32 %v1521_v13, %v1211_v1 }
0x1991   :  { %v1216_v4 = vsel %vm1215_vm15, %v1521_v13, %v1212_v2 }
0x1992   :  { %v1217_v43 = vmul.f32 %v1216_v4, %v1205_v59 }
0x1994   :  { %v1419_v5 = vmul.f32 -1.442695, %v1217_v43 }
0x1996   :  { %1522 = vpow2.f32 %v1419_v5 }
0x199c   :  { %v1523_v44 = vpop.eup %1522 }
0x199d   :  { %v1221_v7 = vadd.f32 1.0, %v1523_v44 }
0x199f   :  { %1524 = vrcp.f32 %v1221_v7  ;;  %v1233_v16 = vand.u32 2147483648, %v1221_v7  ;;  %v1231_v36 = vand.u32 2147483647, %v1221_v7  ;;  %vm1227_vm4 = vweird.f32 %v1221_v7 }
0x19a0   :  { %1526 = vtanh.f32 %v1217_v43 }
0x19a1   :  { %v1234_v22 = vor.u32 1.1754944e-38, %v1233_v16  ;;  %vm1232_vm6 = vcmp.eq.f32.partialorder %v1231_v36, 8.507059e+37 }
0x19a5   :  { %v1525_v8 = vpop.eup %1524 }
0x19a6   :  { %v1223_v11 = vmul.f32 %v1525_v8, %v1221_v7  ;;  %vm1228_vm3 = vweird.f32 %v1525_v8  ;;  %v1527_v61 = vpop.eup %1526 }
0x19a7   :  { %vm1229_vm5 = vmor %vm1227_vm4, %vm1228_vm3 }
0x19a8   :  { %v1224_v14 = vsub.f32 1.0, %v1223_v11 }
0x19aa   :  { %v1225_v20 = vmul.f32 %v1525_v8, %v1224_v14 }
0x19ac   :  { %v1226_v45 = vadd.f32 %v1525_v8, %v1225_v20 }
0x19ae   :  { %v1230_v54 = vsel %vm1229_vm5, %v1525_v8, %v1226_v45 }
0x19af   :  { %v1235_v56 = vsel %vm1232_vm6, %v1234_v22, %v1230_v54 }
0x19b0   :  { %v1238_v62 = vsel %vm52_vm8, %v1235_v56, %v1527_v61 }
0x19b1   :  { %v1239_v27 = vmul.f32 %v1238_v62, %v1216_v4 }
0x19b3   :  { %v1240_v28 = vmul.f32 %v1239_v27, %v1187_v53  ;;  %v1241_v29 = vmul.f32 %v1239_v27, %v1200_v55 }
0x19b5   :  { %1254 = vrot.lane.b32.xlu0 %v1241_v29, %s1532_s26  ;;  %1243 = vrot.lane.b32.xlu2 %v1240_v28, %s1533_s4  ;;  %v1252_v41 = vmul.f32 %v1241_v29, %v1163_v9 }
0x19bd   :  { %1247 = vrot.lane.b32.xlu0 %v1240_v28, %s1532_s26 }
0x1a0f   :  { %v1244_v38 = vpop.permute.xlu2 %1243 }
0x1a10   :  { %v1246_v40 = vmul.f32 %v1244_v38, %v1163_v9 }
0x1a27   :  { %v1255_v32 = vpop.permute.xlu0 %1254 }
0x1a28   :  { %v1257_v33 = vmul.f32 %v1255_v32, %v1241_v29 }
0x1a2a   :  { %1259 = vrot.lane.b32.xlu1 %v1257_v33, %s1532_s26 }
0x1a2f   :  { %v1248_v34 = vpop.permute.xlu0 %1247 }
0x1a30   :  { %v1250_v39 = vmul.f32 %v1248_v34, %v1240_v28 }
0x1a32   :  { %v1251_v3 = vadd.f32 %v1250_v39, %v1246_v40 }
0x1a34   :  { %v1263_v19 = vmul.f32 %v1251_v3, %v1251_v3 }
0x1a9c   :  { %v1260_v42 = vpop.permute.xlu1 %1259 }
0x1a9d   :  { %v1262_v10 = vadd.f32 %v1260_v42, %v1252_v41 }
0x1a9f   :  { %1286 = vrot.lane.b32.xlu2 %v1262_v10, %s1533_s4  ;;  %v1264_v12 = vmul.f32 %v1262_v10, %v1262_v10  ;;  %v1313_v17 = vsel %vm60_vm1, %v1251_v3, %v1262_v10 }
0x1aa0   :  { %1317 = vst.msk [vmem:[#allocation3] sm:$0xff] %vm28_vm0, %v1313_v17 }
0x1aa1   :  { %1266 = vrot.lane.b32.xlu1 %v1264_v12, %s1533_s4 }
0x1af9   :  { %v1287_v50 = vpop.permute.xlu2 %1286 }
0x1b13   :  { %v1267_v46 = vpop.permute.xlu1 %1266 }
0x1b14   :  { %v1269_v18 = vadd.f32 %v1267_v46, %v1263_v19 }
0x1b16   :  { %v1270_v26 = vmax.f32 %v1269_v18, 1e-16 }
0x1b18   :  { %1528 = vrsqrt.f32 %v1270_v26  ;;  %vm1277_vm7 = vweird.f32 %v1270_v26 }
0x1b1e   :  { %v1529_v15 = vpop.eup %1528 }
0x1b1f   :  { %v1272_v23 = vmul.f32 %v1529_v15, %v1270_v26  ;;  %vm1278_vm8 = vweird.f32 %v1529_v15 }
0x1b20   :  { %vm1279_vm9 = vmor %vm1277_vm7, %vm1278_vm8 }
0x1b21   :  { %v1273_v47 = vmul.f32 %v1529_v15, %v1272_v23 }
0x1b23   :  { %v1274_v25 = vmul.f32 0.5, %v1273_v47 }
0x1b25   :  { %v1275_v30 = vsub.f32 1.5, %v1274_v25 }
0x1b27   :  { %v1276_v48 = vmul.f32 %v1529_v15, %v1275_v30 }
0x1b29   :  { %v1280_v31 = vsel %vm1279_vm9, %v1529_v15, %v1276_v48 }
0x1b2a   :  { %v1281_v49 = vmul.f32 %v1280_v31, %v1269_v18 }
0x1b2c   :  { %1530 = vtanh.f32 %v1281_v49 }
0x1b32   :  { %v1531_v35 = vpop.eup %1530 }
0x1b33   :  { %v1283_v37 = vmul.f32 %v1531_v35, %v1280_v31 }
0x1b35   :  { %v1284_v51 = vmul.f32 %v1283_v37, %v1251_v3  ;;  %v1289_v52 = vmul.f32 %v1287_v50, %v1283_v37 }
0x1b37   :  { %1291 = vrot.lane.b32.xlu0 %v1284_v51, %s1534_s27  ;;  %1296 = vrot.lane.b32.xlu1 %v1289_v52, %s1534_s27 }
0x1b3f   :  { %1322 = vrot.lane.b32.xlu1 %v1313_v17, %s1534_s27 }
0x1ba9   :  { %v1292_v53 = vpop.permute.xlu0 %1291  ;;  %v1297_v55 = vpop.permute.xlu1 %1296 }
0x1baa   :  { %v1294_v57 = vmul.f32 %v1292_v53, %v1240_v28  ;;  %v1302_v58 = vmul.f32 %v1292_v53, %v1241_v29  ;;  %v1299_v59 = vmul.f32 %v1297_v55, %v1241_v29  ;;  %v1301_v60 = vmul.f32 %v1297_v55, %v1240_v28 }
0x1bac   :  { %v1300_v6 = vsub.f32 %v1294_v57, %v1299_v59  ;;  %v1303_v24 = vadd.f32 %v1302_v58, %v1301_v60 }
0x1bae   :  { %1309 = vrot.lane.b32.xlu0 %v1303_v24, %s1533_s4  ;;  %1305 = vrot.lane.b32.xlu2 %v1300_v6, %s1534_s27 }
0x1bb1   :  { %v1323_v63 = vpop.permute.xlu1 %1322 }
0x1c08   :  { %v1306_v13 = vpop.permute.xlu2 %1305 }
0x1c20   :  { %v1310_v21 = vpop.permute.xlu0 %1309 }
0x1c21   :  { %v1312_v0 = vsel %vm60_vm1, %v1306_v13, %v1310_v21 }
0x1c22   :  { %1420 = vst.msk [vmem:[%s2092_s5 + $0x38] sm:$0xff] %vm28_vm0, %v1312_v0  ;;  %v1325_v1 = vsel %vm28_vm0, %v1312_v0, %v1323_v63 }
0x1c23   :  { %1316 = vst.msk [vmem:[#allocation2] sm:$0xff] %vm28_vm0, %v1312_v0 }
0x1c24   :  { %1326 = vst [vmem:[%s2093_s6] sm:$0xff] %v1325_v1 }

</bundles_post_ra>
